<compile_context>
chip_gen: v5e
topology: v5e:2x2
jax: 0.10.0
libtpu: 0.0.40
codegen_flags: <defaults>
</compile_context>

<pallas_src>
import jax
import jax.numpy as jnp
from jax.experimental import pallas as pl
from jax.experimental.pallas import tpu as pltpu

_DET_EPS = 1e-6
_FRAMES_PER_BLOCK = 8   # frames processed per grid step (amortizes per-step overhead)


def _border_masks(h, w):
    """Masks zeroing the row/column that a +/-1 roll wraps around the border."""
    row = jax.lax.broadcasted_iota(jnp.int32, (h, w), 0)
    col = jax.lax.broadcasted_iota(jnp.int32, (h, w), 1)
    return {
        (1, 0): row >= 1,        # shift +1 along rows: row 0 is out-of-image
        (-1, 0): row < h - 1,    # shift -1 along rows: last row is out-of-image
        (1, 1): col >= 1,
        (-1, 1): col < w - 1,
    }


def _shift(x, s, axis, masks):
    """result[..., i, ...] = x[..., i - s, ...], zero beyond the border (static s=+-1).

    pltpu.roll is XLU-slot work; the masks are hoisted by the caller, so each
    shift is one rotate + one select (no unaligned slice/concat VMEM copies).
    """
    n = x.shape[axis]
    rolled = pltpu.roll(x, shift=s % n, axis=axis)
    return jnp.where(masks[(s, axis)], rolled, jnp.float32(0.0))


def _lk_flow(g1, g2, masks):
    """Lucas-Kanade (3x3 window) flow taking grayscale g1 -> g2; both (H, W) f32."""
    ix = 0.5 * (_shift(g1, -1, 1, masks) - _shift(g1, 1, 1, masks))   # d/dx (lane axis)
    iy = 0.5 * (_shift(g1, -1, 0, masks) - _shift(g1, 1, 0, masks))   # d/dy (sublane axis)
    it = g2 - g1

    def box3(x):  # separable 3x3 windowed sum (zero padded)
        r = _shift(x, 1, 0, masks) + x + _shift(x, -1, 0, masks)
        return _shift(r, 1, 1, masks) + r + _shift(r, -1, 1, masks)

    sxx = box3(ix * ix)
    syy = box3(iy * iy)
    sxy = box3(ix * iy)
    sxt = box3(ix * it)
    syt = box3(iy * it)

    # Per-pixel 2x2 solve: [u, v] = -M^{-1} b ; zero flow where M is (near) singular.
    det = sxx * syy - sxy * sxy
    valid = det > jnp.float32(_DET_EPS)
    inv_det = pl.reciprocal(jnp.where(valid, det, jnp.float32(1.0)))   # exact (EUP)
    u = jnp.where(valid, (sxy * syt - syy * sxt) * inv_det, jnp.float32(0.0))
    v = jnp.where(valid, (sxy * sxt - sxx * syt) * inv_det, jnp.float32(0.0))
    return u, v


def _gray(frame_chw):
    return jnp.mean(frame_chw.astype(jnp.float32), axis=0)


def _lk_next_kernel(f_ref, fnext_ref, out_ref):
    """reference_frame='next': block b writes flow(frame b*TB+j -> frame b*TB+j+1)
    at pair slot j (j = 0..TB-1).  The last pair's target frame comes from the
    1-frame lookahead operand; pair slots past T-2 fall into the padded tail of
    the output array and are dropped on writeback."""
    tb, _, h, w = f_ref.shape
    masks = _border_masks(h, w)
    g_prev = _gray(f_ref[0])
    for j in range(tb):                       # static unroll over the block
        g_next = _gray(fnext_ref[0]) if j == tb - 1 else _gray(f_ref[j + 1])
        u, v = _lk_flow(g_prev, g_next, masks)
        out_ref[j, 0] = u
        out_ref[j, 1] = v
        g_prev = g_next


def _lk_center_kernel(f_ref, gc_ref, out_ref):
    """reference_frame='center': flow(frames[b*TB+j] -> frames[T//2])."""
    tb, _, h, w = f_ref.shape
    masks = _border_masks(h, w)
    gc = gc_ref[...]                           # resident center grayscale
    for j in range(tb):
        u, v = _lk_flow(_gray(f_ref[j]), gc, masks)
        out_ref[j, 0] = u
        out_ref[j, 1] = v


def _cost_estimate(n_pairs, c, h, w, in_bytes, out_bytes):
    return pl.CostEstimate(
        flops=int(n_pairs * h * w * (6 * c + 70)),
        transcendentals=int(n_pairs * h * w),
        bytes_accessed=int(in_bytes + out_bytes),
    )


def optical_flow_forward(frames, reference_frame="next"):
    """Mirrors OpticalFlowWrapper.forward. Returns List[Dict] of (2, H, W) flow fields."""
    valid_reference_methods = ("next", "center")
    assert reference_frame in valid_reference_methods, \
        "Invalid comparison method for optical flow"

    # Keep the source dtype (uint8 / bf16 frames stay narrow across HBM; the
    # kernel casts).  torch.transpose(3,1); torch.transpose(2,3) == THWC -> TCHW.
    frames = jnp.transpose(jnp.asarray(frames), (0, 3, 1, 2))
    T, C, H, W = frames.shape
    frame_bytes = C * H * W * frames.dtype.itemsize

    # TODO(synk): for production frame sizes, additionally tile H (and W) with a
    # 2-row halo for the central difference + 3x3 box, set an explicit
    # vmem_limit_bytes, and consider pipeline_mode=pl.Buffered(3) on v7x so the
    # ~15 live (H, W) f32 temporaries stay inside the 64 MiB VMEM budget.

    if reference_frame == "next":
        if T < 2:
            return []
        n_pairs = T - 1
        tb = min(_FRAMES_PER_BLOCK, n_pairs)
        nb = pl.cdiv(n_pairs, tb)
        flows = pl.pallas_call(
            _lk_next_kernel,
            out_shape=jax.ShapeDtypeStruct((n_pairs, 2, H, W), jnp.float32),
            grid=(nb,),
            in_specs=[
                # TB frames of the block ...
                pl.BlockSpec((tb, C, H, W), lambda b: (b, 0, 0, 0)),
                # ... plus a 1-frame lookahead for the block's last pair.
                pl.BlockSpec((1, C, H, W),
                             lambda b: (jnp.minimum((b + 1) * tb, T - 1), 0, 0, 0)),
            ],
            out_specs=pl.BlockSpec((tb, 2, H, W), lambda b: (b, 0, 0, 0)),
            compiler_params=pltpu.CompilerParams(
                dimension_semantics=("parallel",)),
            cost_estimate=_cost_estimate(
                n_pairs, C, H, W,
                in_bytes=(T + nb) * frame_bytes,
                out_bytes=n_pairs * 2 * H * W * 4),
        )(frames, frames)
        n = n_pairs
    else:  # 'center'
        # Center grayscale computed once host/XLA-side; resident in VMEM for the
        # whole grid via a constant index_map (C-times smaller than the frame).
        center_gray = jnp.mean(frames[T // 2].astype(jnp.float32), axis=0)   # (H, W)
        tb = min(_FRAMES_PER_BLOCK, T)
        nb = pl.cdiv(T, tb)
        flows = pl.pallas_call(
            _lk_center_kernel,
            out_shape=jax.ShapeDtypeStruct((T, 2, H, W), jnp.float32),
            grid=(nb,),
            in_specs=[
                pl.BlockSpec((tb, C, H, W), lambda b: (b, 0, 0, 0)),
                pl.BlockSpec((H, W), lambda b: (0, 0)),
            ],
            out_specs=pl.BlockSpec((tb, 2, H, W), lambda b: (b, 0, 0, 0)),
            compiler_params=pltpu.CompilerParams(
                dimension_semantics=("parallel",)),
            cost_estimate=_cost_estimate(
                T, C, H, W,
                in_bytes=T * frame_bytes + H * W * 4,
                out_bytes=T * 2 * H * W * 4),
        )(frames, center_gray)
        n = T

    # One result dict per frame pair (mirrors the List[Dict] return of the wrapper).
    return [{"flow": flows[i]} for i in range(n)]


if __name__ == "__main__":
    key = jax.random.PRNGKey(0)
    # Small THWC frame stack; W = 128 keeps the last (lane) axis dense on TPU.
    T, H, W, C = 4, 16, 128, 3
    frames = jax.random.normal(key, (T, H, W, C), dtype=jnp.float32)

    results = optical_flow_forward(frames, reference_frame="next")
    assert len(results) == T - 1
    for r in results:
        f = jax.block_until_ready(r["flow"])
        assert f.shape == (2, H, W)
        assert bool(jnp.all(jnp.isfinite(f)))

    results_center = optical_flow_forward(frames, reference_frame="center")
    assert len(results_center) == T
    for r in results_center:
        f = jax.block_until_ready(r["flow"])
        assert f.shape == (2, H, W)
        assert bool(jnp.all(jnp.isfinite(f)))

    print("KERNEL_OK")
</pallas_src>

<mosaic_0001>
module attributes {stable_mosaic.version = 11 : i64} {
  func.func @_lk_next_kernel(%arg0: i32, %arg1: memref<3x3x16x128xf32, #tpu.memory_space<vmem>>, %arg2: memref<1x3x16x128xf32, #tpu.memory_space<vmem>>, %arg3: memref<3x2x16x128xf32, #tpu.memory_space<vmem>>) attributes {dimension_semantics = [#tpu.dimension_semantics<parallel>], iteration_bounds = array<i64: 1>, scalar_prefetch = 0 : i64, scratch_operands = 0 : i64, tpu.core_type = #tpu.core_type<tc>, window_params = [{transform_indices = @transform_0, window_bounds = array<i64: 3, 3, 16, 128>}, {transform_indices = @transform_1, window_bounds = array<i64: 1, 3, 16, 128>}, {transform_indices = @transform_2, window_bounds = array<i64: 3, 2, 16, 128>}]} {
    %0 = tpu.iota {dimensions = array<i32: 0>} : vector<16x128xi32>
    %1 = tpu.iota {dimensions = array<i32: 1>} : vector<16x128xi32>
    %c1_i32 = arith.constant 1 : i32
    %2 = vector.broadcast %c1_i32 : i32 to vector<16x128xi32>
    %3 = arith.cmpi sge, %0, %2 : vector<16x128xi32>
    %c15_i32 = arith.constant 15 : i32
    %4 = vector.broadcast %c15_i32 : i32 to vector<16x128xi32>
    %5 = arith.cmpi slt, %0, %4 : vector<16x128xi32>
    %c1_i32_0 = arith.constant 1 : i32
    %6 = vector.broadcast %c1_i32_0 : i32 to vector<16x128xi32>
    %7 = arith.cmpi sge, %1, %6 : vector<16x128xi32>
    %c127_i32 = arith.constant 127 : i32
    %8 = vector.broadcast %c127_i32 : i32 to vector<16x128xi32>
    %9 = arith.cmpi slt, %1, %8 : vector<16x128xi32>
    %c0 = arith.constant 0 : index
    %c0_1 = arith.constant 0 : index
    %c0_2 = arith.constant 0 : index
    %c0_3 = arith.constant 0 : index
    %10 = vector.load %arg1[%c0, %c0_1, %c0_2, %c0_3] : memref<3x3x16x128xf32, #tpu.memory_space<vmem>>, vector<1x3x16x128xf32>
    %11 = vector.shape_cast %10 : vector<1x3x16x128xf32> to vector<3x16x128xf32>
    %cst = arith.constant dense<0.000000e+00> : vector<16x128xf32>
    %12 = vector.multi_reduction <add>, %11, %cst [0] : vector<3x16x128xf32> to vector<16x128xf32>
    %cst_4 = arith.constant 3.000000e+00 : f32
    %13 = vector.broadcast %cst_4 : f32 to vector<16x128xf32>
    %14 = arith.divf %12, %13 : vector<16x128xf32>
    %c1 = arith.constant 1 : index
    %c0_5 = arith.constant 0 : index
    %c0_6 = arith.constant 0 : index
    %c0_7 = arith.constant 0 : index
    %15 = vector.load %arg1[%c1, %c0_5, %c0_6, %c0_7] : memref<3x3x16x128xf32, #tpu.memory_space<vmem>>, vector<1x3x16x128xf32>
    %16 = vector.shape_cast %15 : vector<1x3x16x128xf32> to vector<3x16x128xf32>
    %cst_8 = arith.constant dense<0.000000e+00> : vector<16x128xf32>
    %17 = vector.multi_reduction <add>, %16, %cst_8 [0] : vector<3x16x128xf32> to vector<16x128xf32>
    %cst_9 = arith.constant 3.000000e+00 : f32
    %18 = vector.broadcast %cst_9 : f32 to vector<16x128xf32>
    %19 = arith.divf %17, %18 : vector<16x128xf32>
    %c127_i32_10 = arith.constant 127 : i32
    %20 = tpu.dynamic_rotate %14 by %c127_i32_10 dim 1 : vector<16x128xf32>, i32 -> vector<16x128xf32>
    %cst_11 = arith.constant 0.000000e+00 : f32
    %21 = vector.broadcast %cst_11 : f32 to vector<16x128xf32>
    %22 = arith.select %9, %20, %21 : vector<16x128xi1>, vector<16x128xf32>
    %c1_i32_12 = arith.constant 1 : i32
    %23 = tpu.dynamic_rotate %14 by %c1_i32_12 dim 1 : vector<16x128xf32>, i32 -> vector<16x128xf32>
    %cst_13 = arith.constant 0.000000e+00 : f32
    %24 = vector.broadcast %cst_13 : f32 to vector<16x128xf32>
    %25 = arith.select %7, %23, %24 : vector<16x128xi1>, vector<16x128xf32>
    %26 = arith.subf %22, %25 : vector<16x128xf32>
    %cst_14 = arith.constant 5.000000e-01 : f32
    %27 = vector.broadcast %cst_14 : f32 to vector<16x128xf32>
    %28 = arith.mulf %27, %26 : vector<16x128xf32>
    %c15_i32_15 = arith.constant 15 : i32
    %29 = tpu.dynamic_rotate %14 by %c15_i32_15 dim 0 : vector<16x128xf32>, i32 -> vector<16x128xf32>
    %cst_16 = arith.constant 0.000000e+00 : f32
    %30 = vector.broadcast %cst_16 : f32 to vector<16x128xf32>
    %31 = arith.select %5, %29, %30 : vector<16x128xi1>, vector<16x128xf32>
    %c1_i32_17 = arith.constant 1 : i32
    %32 = tpu.dynamic_rotate %14 by %c1_i32_17 dim 0 : vector<16x128xf32>, i32 -> vector<16x128xf32>
    %cst_18 = arith.constant 0.000000e+00 : f32
    %33 = vector.broadcast %cst_18 : f32 to vector<16x128xf32>
    %34 = arith.select %3, %32, %33 : vector<16x128xi1>, vector<16x128xf32>
    %35 = arith.subf %31, %34 : vector<16x128xf32>
    %cst_19 = arith.constant 5.000000e-01 : f32
    %36 = vector.broadcast %cst_19 : f32 to vector<16x128xf32>
    %37 = arith.mulf %36, %35 : vector<16x128xf32>
    %38 = arith.subf %19, %14 : vector<16x128xf32>
    %39 = arith.mulf %28, %28 : vector<16x128xf32>
    %c1_i32_20 = arith.constant 1 : i32
    %40 = tpu.dynamic_rotate %39 by %c1_i32_20 dim 0 : vector<16x128xf32>, i32 -> vector<16x128xf32>
    %cst_21 = arith.constant 0.000000e+00 : f32
    %41 = vector.broadcast %cst_21 : f32 to vector<16x128xf32>
    %42 = arith.select %3, %40, %41 : vector<16x128xi1>, vector<16x128xf32>
    %43 = arith.addf %42, %39 : vector<16x128xf32>
    %c15_i32_22 = arith.constant 15 : i32
    %44 = tpu.dynamic_rotate %39 by %c15_i32_22 dim 0 : vector<16x128xf32>, i32 -> vector<16x128xf32>
    %cst_23 = arith.constant 0.000000e+00 : f32
    %45 = vector.broadcast %cst_23 : f32 to vector<16x128xf32>
    %46 = arith.select %5, %44, %45 : vector<16x128xi1>, vector<16x128xf32>
    %47 = arith.addf %43, %46 : vector<16x128xf32>
    %c1_i32_24 = arith.constant 1 : i32
    %48 = tpu.dynamic_rotate %47 by %c1_i32_24 dim 1 : vector<16x128xf32>, i32 -> vector<16x128xf32>
    %cst_25 = arith.constant 0.000000e+00 : f32
    %49 = vector.broadcast %cst_25 : f32 to vector<16x128xf32>
    %50 = arith.select %7, %48, %49 : vector<16x128xi1>, vector<16x128xf32>
    %51 = arith.addf %50, %47 : vector<16x128xf32>
    %c127_i32_26 = arith.constant 127 : i32
    %52 = tpu.dynamic_rotate %47 by %c127_i32_26 dim 1 : vector<16x128xf32>, i32 -> vector<16x128xf32>
    %cst_27 = arith.constant 0.000000e+00 : f32
    %53 = vector.broadcast %cst_27 : f32 to vector<16x128xf32>
    %54 = arith.select %9, %52, %53 : vector<16x128xi1>, vector<16x128xf32>
    %55 = arith.addf %51, %54 : vector<16x128xf32>
    %56 = arith.mulf %37, %37 : vector<16x128xf32>
    %c1_i32_28 = arith.constant 1 : i32
    %57 = tpu.dynamic_rotate %56 by %c1_i32_28 dim 0 : vector<16x128xf32>, i32 -> vector<16x128xf32>
    %cst_29 = arith.constant 0.000000e+00 : f32
    %58 = vector.broadcast %cst_29 : f32 to vector<16x128xf32>
    %59 = arith.select %3, %57, %58 : vector<16x128xi1>, vector<16x128xf32>
    %60 = arith.addf %59, %56 : vector<16x128xf32>
    %c15_i32_30 = arith.constant 15 : i32
    %61 = tpu.dynamic_rotate %56 by %c15_i32_30 dim 0 : vector<16x128xf32>, i32 -> vector<16x128xf32>
    %cst_31 = arith.constant 0.000000e+00 : f32
    %62 = vector.broadcast %cst_31 : f32 to vector<16x128xf32>
    %63 = arith.select %5, %61, %62 : vector<16x128xi1>, vector<16x128xf32>
    %64 = arith.addf %60, %63 : vector<16x128xf32>
    %c1_i32_32 = arith.constant 1 : i32
    %65 = tpu.dynamic_rotate %64 by %c1_i32_32 dim 1 : vector<16x128xf32>, i32 -> vector<16x128xf32>
    %cst_33 = arith.constant 0.000000e+00 : f32
    %66 = vector.broadcast %cst_33 : f32 to vector<16x128xf32>
    %67 = arith.select %7, %65, %66 : vector<16x128xi1>, vector<16x128xf32>
    %68 = arith.addf %67, %64 : vector<16x128xf32>
    %c127_i32_34 = arith.constant 127 : i32
    %69 = tpu.dynamic_rotate %64 by %c127_i32_34 dim 1 : vector<16x128xf32>, i32 -> vector<16x128xf32>
    %cst_35 = arith.constant 0.000000e+00 : f32
    %70 = vector.broadcast %cst_35 : f32 to vector<16x128xf32>
    %71 = arith.select %9, %69, %70 : vector<16x128xi1>, vector<16x128xf32>
    %72 = arith.addf %68, %71 : vector<16x128xf32>
    %73 = arith.mulf %28, %37 : vector<16x128xf32>
    %c1_i32_36 = arith.constant 1 : i32
    %74 = tpu.dynamic_rotate %73 by %c1_i32_36 dim 0 : vector<16x128xf32>, i32 -> vector<16x128xf32>
    %cst_37 = arith.constant 0.000000e+00 : f32
    %75 = vector.broadcast %cst_37 : f32 to vector<16x128xf32>
    %76 = arith.select %3, %74, %75 : vector<16x128xi1>, vector<16x128xf32>
    %77 = arith.addf %76, %73 : vector<16x128xf32>
    %c15_i32_38 = arith.constant 15 : i32
    %78 = tpu.dynamic_rotate %73 by %c15_i32_38 dim 0 : vector<16x128xf32>, i32 -> vector<16x128xf32>
    %cst_39 = arith.constant 0.000000e+00 : f32
    %79 = vector.broadcast %cst_39 : f32 to vector<16x128xf32>
    %80 = arith.select %5, %78, %79 : vector<16x128xi1>, vector<16x128xf32>
    %81 = arith.addf %77, %80 : vector<16x128xf32>
    %c1_i32_40 = arith.constant 1 : i32
    %82 = tpu.dynamic_rotate %81 by %c1_i32_40 dim 1 : vector<16x128xf32>, i32 -> vector<16x128xf32>
    %cst_41 = arith.constant 0.000000e+00 : f32
    %83 = vector.broadcast %cst_41 : f32 to vector<16x128xf32>
    %84 = arith.select %7, %82, %83 : vector<16x128xi1>, vector<16x128xf32>
    %85 = arith.addf %84, %81 : vector<16x128xf32>
    %c127_i32_42 = arith.constant 127 : i32
    %86 = tpu.dynamic_rotate %81 by %c127_i32_42 dim 1 : vector<16x128xf32>, i32 -> vector<16x128xf32>
    %cst_43 = arith.constant 0.000000e+00 : f32
    %87 = vector.broadcast %cst_43 : f32 to vector<16x128xf32>
    %88 = arith.select %9, %86, %87 : vector<16x128xi1>, vector<16x128xf32>
    %89 = arith.addf %85, %88 : vector<16x128xf32>
    %90 = arith.mulf %28, %38 : vector<16x128xf32>
    %c1_i32_44 = arith.constant 1 : i32
    %91 = tpu.dynamic_rotate %90 by %c1_i32_44 dim 0 : vector<16x128xf32>, i32 -> vector<16x128xf32>
    %cst_45 = arith.constant 0.000000e+00 : f32
    %92 = vector.broadcast %cst_45 : f32 to vector<16x128xf32>
    %93 = arith.select %3, %91, %92 : vector<16x128xi1>, vector<16x128xf32>
    %94 = arith.addf %93, %90 : vector<16x128xf32>
    %c15_i32_46 = arith.constant 15 : i32
    %95 = tpu.dynamic_rotate %90 by %c15_i32_46 dim 0 : vector<16x128xf32>, i32 -> vector<16x128xf32>
    %cst_47 = arith.constant 0.000000e+00 : f32
    %96 = vector.broadcast %cst_47 : f32 to vector<16x128xf32>
    %97 = arith.select %5, %95, %96 : vector<16x128xi1>, vector<16x128xf32>
    %98 = arith.addf %94, %97 : vector<16x128xf32>
    %c1_i32_48 = arith.constant 1 : i32
    %99 = tpu.dynamic_rotate %98 by %c1_i32_48 dim 1 : vector<16x128xf32>, i32 -> vector<16x128xf32>
    %cst_49 = arith.constant 0.000000e+00 : f32
    %100 = vector.broadcast %cst_49 : f32 to vector<16x128xf32>
    %101 = arith.select %7, %99, %100 : vector<16x128xi1>, vector<16x128xf32>
    %102 = arith.addf %101, %98 : vector<16x128xf32>
    %c127_i32_50 = arith.constant 127 : i32
    %103 = tpu.dynamic_rotate %98 by %c127_i32_50 dim 1 : vector<16x128xf32>, i32 -> vector<16x128xf32>
    %cst_51 = arith.constant 0.000000e+00 : f32
    %104 = vector.broadcast %cst_51 : f32 to vector<16x128xf32>
    %105 = arith.select %9, %103, %104 : vector<16x128xi1>, vector<16x128xf32>
    %106 = arith.addf %102, %105 : vector<16x128xf32>
    %107 = arith.mulf %37, %38 : vector<16x128xf32>
    %c1_i32_52 = arith.constant 1 : i32
    %108 = tpu.dynamic_rotate %107 by %c1_i32_52 dim 0 : vector<16x128xf32>, i32 -> vector<16x128xf32>
    %cst_53 = arith.constant 0.000000e+00 : f32
    %109 = vector.broadcast %cst_53 : f32 to vector<16x128xf32>
    %110 = arith.select %3, %108, %109 : vector<16x128xi1>, vector<16x128xf32>
    %111 = arith.addf %110, %107 : vector<16x128xf32>
    %c15_i32_54 = arith.constant 15 : i32
    %112 = tpu.dynamic_rotate %107 by %c15_i32_54 dim 0 : vector<16x128xf32>, i32 -> vector<16x128xf32>
    %cst_55 = arith.constant 0.000000e+00 : f32
    %113 = vector.broadcast %cst_55 : f32 to vector<16x128xf32>
    %114 = arith.select %5, %112, %113 : vector<16x128xi1>, vector<16x128xf32>
    %115 = arith.addf %111, %114 : vector<16x128xf32>
    %c1_i32_56 = arith.constant 1 : i32
    %116 = tpu.dynamic_rotate %115 by %c1_i32_56 dim 1 : vector<16x128xf32>, i32 -> vector<16x128xf32>
    %cst_57 = arith.constant 0.000000e+00 : f32
    %117 = vector.broadcast %cst_57 : f32 to vector<16x128xf32>
    %118 = arith.select %7, %116, %117 : vector<16x128xi1>, vector<16x128xf32>
    %119 = arith.addf %118, %115 : vector<16x128xf32>
    %c127_i32_58 = arith.constant 127 : i32
    %120 = tpu.dynamic_rotate %115 by %c127_i32_58 dim 1 : vector<16x128xf32>, i32 -> vector<16x128xf32>
    %cst_59 = arith.constant 0.000000e+00 : f32
    %121 = vector.broadcast %cst_59 : f32 to vector<16x128xf32>
    %122 = arith.select %9, %120, %121 : vector<16x128xi1>, vector<16x128xf32>
    %123 = arith.addf %119, %122 : vector<16x128xf32>
    %124 = arith.mulf %55, %72 : vector<16x128xf32>
    %125 = arith.mulf %89, %89 : vector<16x128xf32>
    %126 = arith.subf %124, %125 : vector<16x128xf32>
    %cst_60 = arith.constant 9.99999997E-7 : f32
    %127 = vector.broadcast %cst_60 : f32 to vector<16x128xf32>
    %128 = arith.cmpf ogt, %126, %127 : vector<16x128xf32>
    %cst_61 = arith.constant 1.000000e+00 : f32
    %129 = vector.broadcast %cst_61 : f32 to vector<16x128xf32>
    %130 = arith.select %128, %126, %129 : vector<16x128xi1>, vector<16x128xf32>
    %131 = tpu.reciprocal %130 : vector<16x128xf32> -> vector<16x128xf32>
    %132 = arith.mulf %89, %123 : vector<16x128xf32>
    %133 = arith.mulf %72, %106 : vector<16x128xf32>
    %134 = arith.subf %132, %133 : vector<16x128xf32>
    %135 = arith.mulf %134, %131 : vector<16x128xf32>
    %cst_62 = arith.constant 0.000000e+00 : f32
    %136 = vector.broadcast %cst_62 : f32 to vector<16x128xf32>
    %137 = arith.select %128, %135, %136 : vector<16x128xi1>, vector<16x128xf32>
    %138 = arith.mulf %89, %106 : vector<16x128xf32>
    %139 = arith.mulf %55, %123 : vector<16x128xf32>
    %140 = arith.subf %138, %139 : vector<16x128xf32>
    %141 = arith.mulf %140, %131 : vector<16x128xf32>
    %cst_63 = arith.constant 0.000000e+00 : f32
    %142 = vector.broadcast %cst_63 : f32 to vector<16x128xf32>
    %143 = arith.select %128, %141, %142 : vector<16x128xi1>, vector<16x128xf32>
    %c0_64 = arith.constant 0 : index
    %c0_65 = arith.constant 0 : index
    %c0_66 = arith.constant 0 : index
    %c0_67 = arith.constant 0 : index
    %144 = vector.load %arg3[%c0_64, %c0_65, %c0_66, %c0_67] : memref<3x2x16x128xf32, #tpu.memory_space<vmem>>, vector<1x1x16x128xf32>
    %145 = vector.shape_cast %144 : vector<1x1x16x128xf32> to vector<16x128xf32>
    %146 = vector.shape_cast %137 : vector<16x128xf32> to vector<1x1x16x128xf32>
    tpu.vector_store %arg3[%c0_64, %c0_65, %c0_66, %c0_67], %146 {strides = array<i32>} : memref<3x2x16x128xf32, #tpu.memory_space<vmem>>, vector<1x1x16x128xf32>,
    %c0_68 = arith.constant 0 : index
    %c1_69 = arith.constant 1 : index
    %c0_70 = arith.constant 0 : index
    %c0_71 = arith.constant 0 : index
    %147 = vector.load %arg3[%c0_68, %c1_69, %c0_70, %c0_71] : memref<3x2x16x128xf32, #tpu.memory_space<vmem>>, vector<1x1x16x128xf32>
    %148 = vector.shape_cast %147 : vector<1x1x16x128xf32> to vector<16x128xf32>
    %149 = vector.shape_cast %143 : vector<16x128xf32> to vector<1x1x16x128xf32>
    tpu.vector_store %arg3[%c0_68, %c1_69, %c0_70, %c0_71], %149 {strides = array<i32>} : memref<3x2x16x128xf32, #tpu.memory_space<vmem>>, vector<1x1x16x128xf32>,
    %c2 = arith.constant 2 : index
    %c0_72 = arith.constant 0 : index
    %c0_73 = arith.constant 0 : index
    %c0_74 = arith.constant 0 : index
    %150 = vector.load %arg1[%c2, %c0_72, %c0_73, %c0_74] : memref<3x3x16x128xf32, #tpu.memory_space<vmem>>, vector<1x3x16x128xf32>
    %151 = vector.shape_cast %150 : vector<1x3x16x128xf32> to vector<3x16x128xf32>
    %cst_75 = arith.constant dense<0.000000e+00> : vector<16x128xf32>
    %152 = vector.multi_reduction <add>, %151, %cst_75 [0] : vector<3x16x128xf32> to vector<16x128xf32>
    %cst_76 = arith.constant 3.000000e+00 : f32
    %153 = vector.broadcast %cst_76 : f32 to vector<16x128xf32>
    %154 = arith.divf %152, %153 : vector<16x128xf32>
    %c127_i32_77 = arith.constant 127 : i32
    %155 = tpu.dynamic_rotate %19 by %c127_i32_77 dim 1 : vector<16x128xf32>, i32 -> vector<16x128xf32>
    %cst_78 = arith.constant 0.000000e+00 : f32
    %156 = vector.broadcast %cst_78 : f32 to vector<16x128xf32>
    %157 = arith.select %9, %155, %156 : vector<16x128xi1>, vector<16x128xf32>
    %c1_i32_79 = arith.constant 1 : i32
    %158 = tpu.dynamic_rotate %19 by %c1_i32_79 dim 1 : vector<16x128xf32>, i32 -> vector<16x128xf32>
    %cst_80 = arith.constant 0.000000e+00 : f32
    %159 = vector.broadcast %cst_80 : f32 to vector<16x128xf32>
    %160 = arith.select %7, %158, %159 : vector<16x128xi1>, vector<16x128xf32>
    %161 = arith.subf %157, %160 : vector<16x128xf32>
    %cst_81 = arith.constant 5.000000e-01 : f32
    %162 = vector.broadcast %cst_81 : f32 to vector<16x128xf32>
    %163 = arith.mulf %162, %161 : vector<16x128xf32>
    %c15_i32_82 = arith.constant 15 : i32
    %164 = tpu.dynamic_rotate %19 by %c15_i32_82 dim 0 : vector<16x128xf32>, i32 -> vector<16x128xf32>
    %cst_83 = arith.constant 0.000000e+00 : f32
    %165 = vector.broadcast %cst_83 : f32 to vector<16x128xf32>
    %166 = arith.select %5, %164, %165 : vector<16x128xi1>, vector<16x128xf32>
    %c1_i32_84 = arith.constant 1 : i32
    %167 = tpu.dynamic_rotate %19 by %c1_i32_84 dim 0 : vector<16x128xf32>, i32 -> vector<16x128xf32>
    %cst_85 = arith.constant 0.000000e+00 : f32
    %168 = vector.broadcast %cst_85 : f32 to vector<16x128xf32>
    %169 = arith.select %3, %167, %168 : vector<16x128xi1>, vector<16x128xf32>
    %170 = arith.subf %166, %169 : vector<16x128xf32>
    %cst_86 = arith.constant 5.000000e-01 : f32
    %171 = vector.broadcast %cst_86 : f32 to vector<16x128xf32>
    %172 = arith.mulf %171, %170 : vector<16x128xf32>
    %173 = arith.subf %154, %19 : vector<16x128xf32>
    %174 = arith.mulf %163, %163 : vector<16x128xf32>
    %c1_i32_87 = arith.constant 1 : i32
    %175 = tpu.dynamic_rotate %174 by %c1_i32_87 dim 0 : vector<16x128xf32>, i32 -> vector<16x128xf32>
    %cst_88 = arith.constant 0.000000e+00 : f32
    %176 = vector.broadcast %cst_88 : f32 to vector<16x128xf32>
    %177 = arith.select %3, %175, %176 : vector<16x128xi1>, vector<16x128xf32>
    %178 = arith.addf %177, %174 : vector<16x128xf32>
    %c15_i32_89 = arith.constant 15 : i32
    %179 = tpu.dynamic_rotate %174 by %c15_i32_89 dim 0 : vector<16x128xf32>, i32 -> vector<16x128xf32>
    %cst_90 = arith.constant 0.000000e+00 : f32
    %180 = vector.broadcast %cst_90 : f32 to vector<16x128xf32>
    %181 = arith.select %5, %179, %180 : vector<16x128xi1>, vector<16x128xf32>
    %182 = arith.addf %178, %181 : vector<16x128xf32>
    %c1_i32_91 = arith.constant 1 : i32
    %183 = tpu.dynamic_rotate %182 by %c1_i32_91 dim 1 : vector<16x128xf32>, i32 -> vector<16x128xf32>
    %cst_92 = arith.constant 0.000000e+00 : f32
    %184 = vector.broadcast %cst_92 : f32 to vector<16x128xf32>
    %185 = arith.select %7, %183, %184 : vector<16x128xi1>, vector<16x128xf32>
    %186 = arith.addf %185, %182 : vector<16x128xf32>
    %c127_i32_93 = arith.constant 127 : i32
    %187 = tpu.dynamic_rotate %182 by %c127_i32_93 dim 1 : vector<16x128xf32>, i32 -> vector<16x128xf32>
    %cst_94 = arith.constant 0.000000e+00 : f32
    %188 = vector.broadcast %cst_94 : f32 to vector<16x128xf32>
    %189 = arith.select %9, %187, %188 : vector<16x128xi1>, vector<16x128xf32>
    %190 = arith.addf %186, %189 : vector<16x128xf32>
    %191 = arith.mulf %172, %172 : vector<16x128xf32>
    %c1_i32_95 = arith.constant 1 : i32
    %192 = tpu.dynamic_rotate %191 by %c1_i32_95 dim 0 : vector<16x128xf32>, i32 -> vector<16x128xf32>
    %cst_96 = arith.constant 0.000000e+00 : f32
    %193 = vector.broadcast %cst_96 : f32 to vector<16x128xf32>
    %194 = arith.select %3, %192, %193 : vector<16x128xi1>, vector<16x128xf32>
    %195 = arith.addf %194, %191 : vector<16x128xf32>
    %c15_i32_97 = arith.constant 15 : i32
    %196 = tpu.dynamic_rotate %191 by %c15_i32_97 dim 0 : vector<16x128xf32>, i32 -> vector<16x128xf32>
    %cst_98 = arith.constant 0.000000e+00 : f32
    %197 = vector.broadcast %cst_98 : f32 to vector<16x128xf32>
    %198 = arith.select %5, %196, %197 : vector<16x128xi1>, vector<16x128xf32>
    %199 = arith.addf %195, %198 : vector<16x128xf32>
    %c1_i32_99 = arith.constant 1 : i32
    %200 = tpu.dynamic_rotate %199 by %c1_i32_99 dim 1 : vector<16x128xf32>, i32 -> vector<16x128xf32>
    %cst_100 = arith.constant 0.000000e+00 : f32
    %201 = vector.broadcast %cst_100 : f32 to vector<16x128xf32>
    %202 = arith.select %7, %200, %201 : vector<16x128xi1>, vector<16x128xf32>
    %203 = arith.addf %202, %199 : vector<16x128xf32>
    %c127_i32_101 = arith.constant 127 : i32
    %204 = tpu.dynamic_rotate %199 by %c127_i32_101 dim 1 : vector<16x128xf32>, i32 -> vector<16x128xf32>
    %cst_102 = arith.constant 0.000000e+00 : f32
    %205 = vector.broadcast %cst_102 : f32 to vector<16x128xf32>
    %206 = arith.select %9, %204, %205 : vector<16x128xi1>, vector<16x128xf32>
    %207 = arith.addf %203, %206 : vector<16x128xf32>
    %208 = arith.mulf %163, %172 : vector<16x128xf32>
    %c1_i32_103 = arith.constant 1 : i32
    %209 = tpu.dynamic_rotate %208 by %c1_i32_103 dim 0 : vector<16x128xf32>, i32 -> vector<16x128xf32>
    %cst_104 = arith.constant 0.000000e+00 : f32
    %210 = vector.broadcast %cst_104 : f32 to vector<16x128xf32>
    %211 = arith.select %3, %209, %210 : vector<16x128xi1>, vector<16x128xf32>
    %212 = arith.addf %211, %208 : vector<16x128xf32>
    %c15_i32_105 = arith.constant 15 : i32
    %213 = tpu.dynamic_rotate %208 by %c15_i32_105 dim 0 : vector<16x128xf32>, i32 -> vector<16x128xf32>
    %cst_106 = arith.constant 0.000000e+00 : f32
    %214 = vector.broadcast %cst_106 : f32 to vector<16x128xf32>
    %215 = arith.select %5, %213, %214 : vector<16x128xi1>, vector<16x128xf32>
    %216 = arith.addf %212, %215 : vector<16x128xf32>
    %c1_i32_107 = arith.constant 1 : i32
    %217 = tpu.dynamic_rotate %216 by %c1_i32_107 dim 1 : vector<16x128xf32>, i32 -> vector<16x128xf32>
    %cst_108 = arith.constant 0.000000e+00 : f32
    %218 = vector.broadcast %cst_108 : f32 to vector<16x128xf32>
    %219 = arith.select %7, %217, %218 : vector<16x128xi1>, vector<16x128xf32>
    %220 = arith.addf %219, %216 : vector<16x128xf32>
    %c127_i32_109 = arith.constant 127 : i32
    %221 = tpu.dynamic_rotate %216 by %c127_i32_109 dim 1 : vector<16x128xf32>, i32 -> vector<16x128xf32>
    %cst_110 = arith.constant 0.000000e+00 : f32
    %222 = vector.broadcast %cst_110 : f32 to vector<16x128xf32>
    %223 = arith.select %9, %221, %222 : vector<16x128xi1>, vector<16x128xf32>
    %224 = arith.addf %220, %223 : vector<16x128xf32>
    %225 = arith.mulf %163, %173 : vector<16x128xf32>
    %c1_i32_111 = arith.constant 1 : i32
    %226 = tpu.dynamic_rotate %225 by %c1_i32_111 dim 0 : vector<16x128xf32>, i32 -> vector<16x128xf32>
    %cst_112 = arith.constant 0.000000e+00 : f32
    %227 = vector.broadcast %cst_112 : f32 to vector<16x128xf32>
    %228 = arith.select %3, %226, %227 : vector<16x128xi1>, vector<16x128xf32>
    %229 = arith.addf %228, %225 : vector<16x128xf32>
    %c15_i32_113 = arith.constant 15 : i32
    %230 = tpu.dynamic_rotate %225 by %c15_i32_113 dim 0 : vector<16x128xf32>, i32 -> vector<16x128xf32>
    %cst_114 = arith.constant 0.000000e+00 : f32
    %231 = vector.broadcast %cst_114 : f32 to vector<16x128xf32>
    %232 = arith.select %5, %230, %231 : vector<16x128xi1>, vector<16x128xf32>
    %233 = arith.addf %229, %232 : vector<16x128xf32>
    %c1_i32_115 = arith.constant 1 : i32
    %234 = tpu.dynamic_rotate %233 by %c1_i32_115 dim 1 : vector<16x128xf32>, i32 -> vector<16x128xf32>
    %cst_116 = arith.constant 0.000000e+00 : f32
    %235 = vector.broadcast %cst_116 : f32 to vector<16x128xf32>
    %236 = arith.select %7, %234, %235 : vector<16x128xi1>, vector<16x128xf32>
    %237 = arith.addf %236, %233 : vector<16x128xf32>
    %c127_i32_117 = arith.constant 127 : i32
    %238 = tpu.dynamic_rotate %233 by %c127_i32_117 dim 1 : vector<16x128xf32>, i32 -> vector<16x128xf32>
    %cst_118 = arith.constant 0.000000e+00 : f32
    %239 = vector.broadcast %cst_118 : f32 to vector<16x128xf32>
    %240 = arith.select %9, %238, %239 : vector<16x128xi1>, vector<16x128xf32>
    %241 = arith.addf %237, %240 : vector<16x128xf32>
    %242 = arith.mulf %172, %173 : vector<16x128xf32>
    %c1_i32_119 = arith.constant 1 : i32
    %243 = tpu.dynamic_rotate %242 by %c1_i32_119 dim 0 : vector<16x128xf32>, i32 -> vector<16x128xf32>
    %cst_120 = arith.constant 0.000000e+00 : f32
    %244 = vector.broadcast %cst_120 : f32 to vector<16x128xf32>
    %245 = arith.select %3, %243, %244 : vector<16x128xi1>, vector<16x128xf32>
    %246 = arith.addf %245, %242 : vector<16x128xf32>
    %c15_i32_121 = arith.constant 15 : i32
    %247 = tpu.dynamic_rotate %242 by %c15_i32_121 dim 0 : vector<16x128xf32>, i32 -> vector<16x128xf32>
    %cst_122 = arith.constant 0.000000e+00 : f32
    %248 = vector.broadcast %cst_122 : f32 to vector<16x128xf32>
    %249 = arith.select %5, %247, %248 : vector<16x128xi1>, vector<16x128xf32>
    %250 = arith.addf %246, %249 : vector<16x128xf32>
    %c1_i32_123 = arith.constant 1 : i32
    %251 = tpu.dynamic_rotate %250 by %c1_i32_123 dim 1 : vector<16x128xf32>, i32 -> vector<16x128xf32>
    %cst_124 = arith.constant 0.000000e+00 : f32
    %252 = vector.broadcast %cst_124 : f32 to vector<16x128xf32>
    %253 = arith.select %7, %251, %252 : vector<16x128xi1>, vector<16x128xf32>
    %254 = arith.addf %253, %250 : vector<16x128xf32>
    %c127_i32_125 = arith.constant 127 : i32
    %255 = tpu.dynamic_rotate %250 by %c127_i32_125 dim 1 : vector<16x128xf32>, i32 -> vector<16x128xf32>
    %cst_126 = arith.constant 0.000000e+00 : f32
    %256 = vector.broadcast %cst_126 : f32 to vector<16x128xf32>
    %257 = arith.select %9, %255, %256 : vector<16x128xi1>, vector<16x128xf32>
    %258 = arith.addf %254, %257 : vector<16x128xf32>
    %259 = arith.mulf %190, %207 : vector<16x128xf32>
    %260 = arith.mulf %224, %224 : vector<16x128xf32>
    %261 = arith.subf %259, %260 : vector<16x128xf32>
    %cst_127 = arith.constant 9.99999997E-7 : f32
    %262 = vector.broadcast %cst_127 : f32 to vector<16x128xf32>
    %263 = arith.cmpf ogt, %261, %262 : vector<16x128xf32>
    %cst_128 = arith.constant 1.000000e+00 : f32
    %264 = vector.broadcast %cst_128 : f32 to vector<16x128xf32>
    %265 = arith.select %263, %261, %264 : vector<16x128xi1>, vector<16x128xf32>
    %266 = tpu.reciprocal %265 : vector<16x128xf32> -> vector<16x128xf32>
    %267 = arith.mulf %224, %258 : vector<16x128xf32>
    %268 = arith.mulf %207, %241 : vector<16x128xf32>
    %269 = arith.subf %267, %268 : vector<16x128xf32>
    %270 = arith.mulf %269, %266 : vector<16x128xf32>
    %cst_129 = arith.constant 0.000000e+00 : f32
    %271 = vector.broadcast %cst_129 : f32 to vector<16x128xf32>
    %272 = arith.select %263, %270, %271 : vector<16x128xi1>, vector<16x128xf32>
    %273 = arith.mulf %224, %241 : vector<16x128xf32>
    %274 = arith.mulf %190, %258 : vector<16x128xf32>
    %275 = arith.subf %273, %274 : vector<16x128xf32>
    %276 = arith.mulf %275, %266 : vector<16x128xf32>
    %cst_130 = arith.constant 0.000000e+00 : f32
    %277 = vector.broadcast %cst_130 : f32 to vector<16x128xf32>
    %278 = arith.select %263, %276, %277 : vector<16x128xi1>, vector<16x128xf32>
    %c1_131 = arith.constant 1 : index
    %c0_132 = arith.constant 0 : index
    %c0_133 = arith.constant 0 : index
    %c0_134 = arith.constant 0 : index
    %279 = vector.load %arg3[%c1_131, %c0_132, %c0_133, %c0_134] : memref<3x2x16x128xf32, #tpu.memory_space<vmem>>, vector<1x1x16x128xf32>
    %280 = vector.shape_cast %279 : vector<1x1x16x128xf32> to vector<16x128xf32>
    %281 = vector.shape_cast %272 : vector<16x128xf32> to vector<1x1x16x128xf32>
    tpu.vector_store %arg3[%c1_131, %c0_132, %c0_133, %c0_134], %281 {strides = array<i32>} : memref<3x2x16x128xf32, #tpu.memory_space<vmem>>, vector<1x1x16x128xf32>,
    %c1_135 = arith.constant 1 : index
    %c1_136 = arith.constant 1 : index
    %c0_137 = arith.constant 0 : index
    %c0_138 = arith.constant 0 : index
    %282 = vector.load %arg3[%c1_135, %c1_136, %c0_137, %c0_138] : memref<3x2x16x128xf32, #tpu.memory_space<vmem>>, vector<1x1x16x128xf32>
    %283 = vector.shape_cast %282 : vector<1x1x16x128xf32> to vector<16x128xf32>
    %284 = vector.shape_cast %278 : vector<16x128xf32> to vector<1x1x16x128xf32>
    tpu.vector_store %arg3[%c1_135, %c1_136, %c0_137, %c0_138], %284 {strides = array<i32>} : memref<3x2x16x128xf32, #tpu.memory_space<vmem>>, vector<1x1x16x128xf32>,
    %c0_139 = arith.constant 0 : index
    %c0_140 = arith.constant 0 : index
    %c0_141 = arith.constant 0 : index
    %c0_142 = arith.constant 0 : index
    %285 = vector.load %arg2[%c0_139, %c0_140, %c0_141, %c0_142] : memref<1x3x16x128xf32, #tpu.memory_space<vmem>>, vector<1x3x16x128xf32>
    %286 = vector.shape_cast %285 : vector<1x3x16x128xf32> to vector<3x16x128xf32>
    %cst_143 = arith.constant dense<0.000000e+00> : vector<16x128xf32>
    %287 = vector.multi_reduction <add>, %286, %cst_143 [0] : vector<3x16x128xf32> to vector<16x128xf32>
    %cst_144 = arith.constant 3.000000e+00 : f32
    %288 = vector.broadcast %cst_144 : f32 to vector<16x128xf32>
    %289 = arith.divf %287, %288 : vector<16x128xf32>
    %c127_i32_145 = arith.constant 127 : i32
    %290 = tpu.dynamic_rotate %154 by %c127_i32_145 dim 1 : vector<16x128xf32>, i32 -> vector<16x128xf32>
    %cst_146 = arith.constant 0.000000e+00 : f32
    %291 = vector.broadcast %cst_146 : f32 to vector<16x128xf32>
    %292 = arith.select %9, %290, %291 : vector<16x128xi1>, vector<16x128xf32>
    %c1_i32_147 = arith.constant 1 : i32
    %293 = tpu.dynamic_rotate %154 by %c1_i32_147 dim 1 : vector<16x128xf32>, i32 -> vector<16x128xf32>
    %cst_148 = arith.constant 0.000000e+00 : f32
    %294 = vector.broadcast %cst_148 : f32 to vector<16x128xf32>
    %295 = arith.select %7, %293, %294 : vector<16x128xi1>, vector<16x128xf32>
    %296 = arith.subf %292, %295 : vector<16x128xf32>
    %cst_149 = arith.constant 5.000000e-01 : f32
    %297 = vector.broadcast %cst_149 : f32 to vector<16x128xf32>
    %298 = arith.mulf %297, %296 : vector<16x128xf32>
    %c15_i32_150 = arith.constant 15 : i32
    %299 = tpu.dynamic_rotate %154 by %c15_i32_150 dim 0 : vector<16x128xf32>, i32 -> vector<16x128xf32>
    %cst_151 = arith.constant 0.000000e+00 : f32
    %300 = vector.broadcast %cst_151 : f32 to vector<16x128xf32>
    %301 = arith.select %5, %299, %300 : vector<16x128xi1>, vector<16x128xf32>
    %c1_i32_152 = arith.constant 1 : i32
    %302 = tpu.dynamic_rotate %154 by %c1_i32_152 dim 0 : vector<16x128xf32>, i32 -> vector<16x128xf32>
    %cst_153 = arith.constant 0.000000e+00 : f32
    %303 = vector.broadcast %cst_153 : f32 to vector<16x128xf32>
    %304 = arith.select %3, %302, %303 : vector<16x128xi1>, vector<16x128xf32>
    %305 = arith.subf %301, %304 : vector<16x128xf32>
    %cst_154 = arith.constant 5.000000e-01 : f32
    %306 = vector.broadcast %cst_154 : f32 to vector<16x128xf32>
    %307 = arith.mulf %306, %305 : vector<16x128xf32>
    %308 = arith.subf %289, %154 : vector<16x128xf32>
    %309 = arith.mulf %298, %298 : vector<16x128xf32>
    %c1_i32_155 = arith.constant 1 : i32
    %310 = tpu.dynamic_rotate %309 by %c1_i32_155 dim 0 : vector<16x128xf32>, i32 -> vector<16x128xf32>
    %cst_156 = arith.constant 0.000000e+00 : f32
    %311 = vector.broadcast %cst_156 : f32 to vector<16x128xf32>
    %312 = arith.select %3, %310, %311 : vector<16x128xi1>, vector<16x128xf32>
    %313 = arith.addf %312, %309 : vector<16x128xf32>
    %c15_i32_157 = arith.constant 15 : i32
    %314 = tpu.dynamic_rotate %309 by %c15_i32_157 dim 0 : vector<16x128xf32>, i32 -> vector<16x128xf32>
    %cst_158 = arith.constant 0.000000e+00 : f32
    %315 = vector.broadcast %cst_158 : f32 to vector<16x128xf32>
    %316 = arith.select %5, %314, %315 : vector<16x128xi1>, vector<16x128xf32>
    %317 = arith.addf %313, %316 : vector<16x128xf32>
    %c1_i32_159 = arith.constant 1 : i32
    %318 = tpu.dynamic_rotate %317 by %c1_i32_159 dim 1 : vector<16x128xf32>, i32 -> vector<16x128xf32>
    %cst_160 = arith.constant 0.000000e+00 : f32
    %319 = vector.broadcast %cst_160 : f32 to vector<16x128xf32>
    %320 = arith.select %7, %318, %319 : vector<16x128xi1>, vector<16x128xf32>
    %321 = arith.addf %320, %317 : vector<16x128xf32>
    %c127_i32_161 = arith.constant 127 : i32
    %322 = tpu.dynamic_rotate %317 by %c127_i32_161 dim 1 : vector<16x128xf32>, i32 -> vector<16x128xf32>
    %cst_162 = arith.constant 0.000000e+00 : f32
    %323 = vector.broadcast %cst_162 : f32 to vector<16x128xf32>
    %324 = arith.select %9, %322, %323 : vector<16x128xi1>, vector<16x128xf32>
    %325 = arith.addf %321, %324 : vector<16x128xf32>
    %326 = arith.mulf %307, %307 : vector<16x128xf32>
    %c1_i32_163 = arith.constant 1 : i32
    %327 = tpu.dynamic_rotate %326 by %c1_i32_163 dim 0 : vector<16x128xf32>, i32 -> vector<16x128xf32>
    %cst_164 = arith.constant 0.000000e+00 : f32
    %328 = vector.broadcast %cst_164 : f32 to vector<16x128xf32>
    %329 = arith.select %3, %327, %328 : vector<16x128xi1>, vector<16x128xf32>
    %330 = arith.addf %329, %326 : vector<16x128xf32>
    %c15_i32_165 = arith.constant 15 : i32
    %331 = tpu.dynamic_rotate %326 by %c15_i32_165 dim 0 : vector<16x128xf32>, i32 -> vector<16x128xf32>
    %cst_166 = arith.constant 0.000000e+00 : f32
    %332 = vector.broadcast %cst_166 : f32 to vector<16x128xf32>
    %333 = arith.select %5, %331, %332 : vector<16x128xi1>, vector<16x128xf32>
    %334 = arith.addf %330, %333 : vector<16x128xf32>
    %c1_i32_167 = arith.constant 1 : i32
    %335 = tpu.dynamic_rotate %334 by %c1_i32_167 dim 1 : vector<16x128xf32>, i32 -> vector<16x128xf32>
    %cst_168 = arith.constant 0.000000e+00 : f32
    %336 = vector.broadcast %cst_168 : f32 to vector<16x128xf32>
    %337 = arith.select %7, %335, %336 : vector<16x128xi1>, vector<16x128xf32>
    %338 = arith.addf %337, %334 : vector<16x128xf32>
    %c127_i32_169 = arith.constant 127 : i32
    %339 = tpu.dynamic_rotate %334 by %c127_i32_169 dim 1 : vector<16x128xf32>, i32 -> vector<16x128xf32>
    %cst_170 = arith.constant 0.000000e+00 : f32
    %340 = vector.broadcast %cst_170 : f32 to vector<16x128xf32>
    %341 = arith.select %9, %339, %340 : vector<16x128xi1>, vector<16x128xf32>
    %342 = arith.addf %338, %341 : vector<16x128xf32>
    %343 = arith.mulf %298, %307 : vector<16x128xf32>
    %c1_i32_171 = arith.constant 1 : i32
    %344 = tpu.dynamic_rotate %343 by %c1_i32_171 dim 0 : vector<16x128xf32>, i32 -> vector<16x128xf32>
    %cst_172 = arith.constant 0.000000e+00 : f32
    %345 = vector.broadcast %cst_172 : f32 to vector<16x128xf32>
    %346 = arith.select %3, %344, %345 : vector<16x128xi1>, vector<16x128xf32>
    %347 = arith.addf %346, %343 : vector<16x128xf32>
    %c15_i32_173 = arith.constant 15 : i32
    %348 = tpu.dynamic_rotate %343 by %c15_i32_173 dim 0 : vector<16x128xf32>, i32 -> vector<16x128xf32>
    %cst_174 = arith.constant 0.000000e+00 : f32
    %349 = vector.broadcast %cst_174 : f32 to vector<16x128xf32>
    %350 = arith.select %5, %348, %349 : vector<16x128xi1>, vector<16x128xf32>
    %351 = arith.addf %347, %350 : vector<16x128xf32>
    %c1_i32_175 = arith.constant 1 : i32
    %352 = tpu.dynamic_rotate %351 by %c1_i32_175 dim 1 : vector<16x128xf32>, i32 -> vector<16x128xf32>
    %cst_176 = arith.constant 0.000000e+00 : f32
    %353 = vector.broadcast %cst_176 : f32 to vector<16x128xf32>
    %354 = arith.select %7, %352, %353 : vector<16x128xi1>, vector<16x128xf32>
    %355 = arith.addf %354, %351 : vector<16x128xf32>
    %c127_i32_177 = arith.constant 127 : i32
    %356 = tpu.dynamic_rotate %351 by %c127_i32_177 dim 1 : vector<16x128xf32>, i32 -> vector<16x128xf32>
    %cst_178 = arith.constant 0.000000e+00 : f32
    %357 = vector.broadcast %cst_178 : f32 to vector<16x128xf32>
    %358 = arith.select %9, %356, %357 : vector<16x128xi1>, vector<16x128xf32>
    %359 = arith.addf %355, %358 : vector<16x128xf32>
    %360 = arith.mulf %298, %308 : vector<16x128xf32>
    %c1_i32_179 = arith.constant 1 : i32
    %361 = tpu.dynamic_rotate %360 by %c1_i32_179 dim 0 : vector<16x128xf32>, i32 -> vector<16x128xf32>
    %cst_180 = arith.constant 0.000000e+00 : f32
    %362 = vector.broadcast %cst_180 : f32 to vector<16x128xf32>
    %363 = arith.select %3, %361, %362 : vector<16x128xi1>, vector<16x128xf32>
    %364 = arith.addf %363, %360 : vector<16x128xf32>
    %c15_i32_181 = arith.constant 15 : i32
    %365 = tpu.dynamic_rotate %360 by %c15_i32_181 dim 0 : vector<16x128xf32>, i32 -> vector<16x128xf32>
    %cst_182 = arith.constant 0.000000e+00 : f32
    %366 = vector.broadcast %cst_182 : f32 to vector<16x128xf32>
    %367 = arith.select %5, %365, %366 : vector<16x128xi1>, vector<16x128xf32>
    %368 = arith.addf %364, %367 : vector<16x128xf32>
    %c1_i32_183 = arith.constant 1 : i32
    %369 = tpu.dynamic_rotate %368 by %c1_i32_183 dim 1 : vector<16x128xf32>, i32 -> vector<16x128xf32>
    %cst_184 = arith.constant 0.000000e+00 : f32
    %370 = vector.broadcast %cst_184 : f32 to vector<16x128xf32>
    %371 = arith.select %7, %369, %370 : vector<16x128xi1>, vector<16x128xf32>
    %372 = arith.addf %371, %368 : vector<16x128xf32>
    %c127_i32_185 = arith.constant 127 : i32
    %373 = tpu.dynamic_rotate %368 by %c127_i32_185 dim 1 : vector<16x128xf32>, i32 -> vector<16x128xf32>
    %cst_186 = arith.constant 0.000000e+00 : f32
    %374 = vector.broadcast %cst_186 : f32 to vector<16x128xf32>
    %375 = arith.select %9, %373, %374 : vector<16x128xi1>, vector<16x128xf32>
    %376 = arith.addf %372, %375 : vector<16x128xf32>
    %377 = arith.mulf %307, %308 : vector<16x128xf32>
    %c1_i32_187 = arith.constant 1 : i32
    %378 = tpu.dynamic_rotate %377 by %c1_i32_187 dim 0 : vector<16x128xf32>, i32 -> vector<16x128xf32>
    %cst_188 = arith.constant 0.000000e+00 : f32
    %379 = vector.broadcast %cst_188 : f32 to vector<16x128xf32>
    %380 = arith.select %3, %378, %379 : vector<16x128xi1>, vector<16x128xf32>
    %381 = arith.addf %380, %377 : vector<16x128xf32>
    %c15_i32_189 = arith.constant 15 : i32
    %382 = tpu.dynamic_rotate %377 by %c15_i32_189 dim 0 : vector<16x128xf32>, i32 -> vector<16x128xf32>
    %cst_190 = arith.constant 0.000000e+00 : f32
    %383 = vector.broadcast %cst_190 : f32 to vector<16x128xf32>
    %384 = arith.select %5, %382, %383 : vector<16x128xi1>, vector<16x128xf32>
    %385 = arith.addf %381, %384 : vector<16x128xf32>
    %c1_i32_191 = arith.constant 1 : i32
    %386 = tpu.dynamic_rotate %385 by %c1_i32_191 dim 1 : vector<16x128xf32>, i32 -> vector<16x128xf32>
    %cst_192 = arith.constant 0.000000e+00 : f32
    %387 = vector.broadcast %cst_192 : f32 to vector<16x128xf32>
    %388 = arith.select %7, %386, %387 : vector<16x128xi1>, vector<16x128xf32>
    %389 = arith.addf %388, %385 : vector<16x128xf32>
    %c127_i32_193 = arith.constant 127 : i32
    %390 = tpu.dynamic_rotate %385 by %c127_i32_193 dim 1 : vector<16x128xf32>, i32 -> vector<16x128xf32>
    %cst_194 = arith.constant 0.000000e+00 : f32
    %391 = vector.broadcast %cst_194 : f32 to vector<16x128xf32>
    %392 = arith.select %9, %390, %391 : vector<16x128xi1>, vector<16x128xf32>
    %393 = arith.addf %389, %392 : vector<16x128xf32>
    %394 = arith.mulf %325, %342 : vector<16x128xf32>
    %395 = arith.mulf %359, %359 : vector<16x128xf32>
    %396 = arith.subf %394, %395 : vector<16x128xf32>
    %cst_195 = arith.constant 9.99999997E-7 : f32
    %397 = vector.broadcast %cst_195 : f32 to vector<16x128xf32>
    %398 = arith.cmpf ogt, %396, %397 : vector<16x128xf32>
    %cst_196 = arith.constant 1.000000e+00 : f32
    %399 = vector.broadcast %cst_196 : f32 to vector<16x128xf32>
    %400 = arith.select %398, %396, %399 : vector<16x128xi1>, vector<16x128xf32>
    %401 = tpu.reciprocal %400 : vector<16x128xf32> -> vector<16x128xf32>
    %402 = arith.mulf %359, %393 : vector<16x128xf32>
    %403 = arith.mulf %342, %376 : vector<16x128xf32>
    %404 = arith.subf %402, %403 : vector<16x128xf32>
    %405 = arith.mulf %404, %401 : vector<16x128xf32>
    %cst_197 = arith.constant 0.000000e+00 : f32
    %406 = vector.broadcast %cst_197 : f32 to vector<16x128xf32>
    %407 = arith.select %398, %405, %406 : vector<16x128xi1>, vector<16x128xf32>
    %408 = arith.mulf %359, %376 : vector<16x128xf32>
    %409 = arith.mulf %325, %393 : vector<16x128xf32>
    %410 = arith.subf %408, %409 : vector<16x128xf32>
    %411 = arith.mulf %410, %401 : vector<16x128xf32>
    %cst_198 = arith.constant 0.000000e+00 : f32
    %412 = vector.broadcast %cst_198 : f32 to vector<16x128xf32>
    %413 = arith.select %398, %411, %412 : vector<16x128xi1>, vector<16x128xf32>
    %c2_199 = arith.constant 2 : index
    %c0_200 = arith.constant 0 : index
    %c0_201 = arith.constant 0 : index
    %c0_202 = arith.constant 0 : index
    %414 = vector.load %arg3[%c2_199, %c0_200, %c0_201, %c0_202] : memref<3x2x16x128xf32, #tpu.memory_space<vmem>>, vector<1x1x16x128xf32>
    %415 = vector.shape_cast %414 : vector<1x1x16x128xf32> to vector<16x128xf32>
    %416 = vector.shape_cast %407 : vector<16x128xf32> to vector<1x1x16x128xf32>
    tpu.vector_store %arg3[%c2_199, %c0_200, %c0_201, %c0_202], %416 {strides = array<i32>} : memref<3x2x16x128xf32, #tpu.memory_space<vmem>>, vector<1x1x16x128xf32>,
    %c2_203 = arith.constant 2 : index
    %c1_204 = arith.constant 1 : index
    %c0_205 = arith.constant 0 : index
    %c0_206 = arith.constant 0 : index
    %417 = vector.load %arg3[%c2_203, %c1_204, %c0_205, %c0_206] : memref<3x2x16x128xf32, #tpu.memory_space<vmem>>, vector<1x1x16x128xf32>
    %418 = vector.shape_cast %417 : vector<1x1x16x128xf32> to vector<16x128xf32>
    %419 = vector.shape_cast %413 : vector<16x128xf32> to vector<1x1x16x128xf32>
    tpu.vector_store %arg3[%c2_203, %c1_204, %c0_205, %c0_206], %419 {strides = array<i32>} : memref<3x2x16x128xf32, #tpu.memory_space<vmem>>, vector<1x1x16x128xf32>,
    return
  }
  func.func @transform_0(%arg0: i32) -> (i32, i32, i32, i32) {
    %c0_i32 = arith.constant 0 : i32
    %c0_i32_0 = arith.constant 0 : i32
    %c0_i32_1 = arith.constant 0 : i32
    %c0_i32_2 = arith.constant 0 : i32
    return %arg0, %c0_i32, %c0_i32_0, %c0_i32_1 : i32, i32, i32, i32
  }
  func.func @transform_1(%arg0: i32) -> (i32, i32, i32, i32) {
    %c1_i32 = arith.constant 1 : i32
    %0 = arith.addi %arg0, %c1_i32 : i32
    %c3_i32 = arith.constant 3 : i32
    %1 = arith.muli %0, %c3_i32 : i32
    %c3_i32_0 = arith.constant 3 : i32
    %2 = arith.minsi %1, %c3_i32_0 : i32
    %c0_i32 = arith.constant 0 : i32
    %c0_i32_1 = arith.constant 0 : i32
    %c0_i32_2 = arith.constant 0 : i32
    %c0_i32_3 = arith.constant 0 : i32
    return %2, %c0_i32, %c0_i32_1, %c0_i32_2 : i32, i32, i32, i32
  }
  func.func @transform_2(%arg0: i32) -> (i32, i32, i32, i32) {
    %c0_i32 = arith.constant 0 : i32
    %c0_i32_0 = arith.constant 0 : i32
    %c0_i32_1 = arith.constant 0 : i32
    %c0_i32_2 = arith.constant 0 : i32
    return %arg0, %c0_i32, %c0_i32_0, %c0_i32_1 : i32, i32, i32, i32
  }
}

</mosaic_0001>

<bundles_post_ra>
// kernel: tpu_custom_call.1
= control target key start
LH: loop header
LB: loop body
LE: loop exit
PB: predicated region body
PF: predicated region fallthrough
CT: control target
= control target key end

     0   :  { %7 = vsyncpa [#allocation3], 0  ;;  %s2237_s0 = inlined_call_operand.hbm [shape: f32[4,3,16,128], index: 0, kind: input, shape index: {}]   ;;  %s2238_s1 = inlined_call_operand.hbm [shape: f32[4,3,16,128], index: 1, kind: input, shape index: {}]   ;;  %s2239_s2 = inlined_call_operand.hbm [shape: f32[3,2,16,128], index: 2, kind: output, shape index: {}]  }
   0x1   :  { %8 = vsyncpa [#allocation6], 0 }
   0x2   :  { %9 = vsyncpa [#allocation4], 0  ;;  %s14_s11 = sshll.u32 %s2237_s0, 4  ;;  %s1050_s12 = smov [#allocation2]   ;;  %s15_s11 = int_to_ptr.hbm [resolvable:$true] %s14_s11 }
   0x3   :  { %s16_s13 = sshll.u32 %s1050_s12, 4  ;;  %s33_s16 = scalar_lea.hbm %s2238_s1, 144  ;;  %s17_s13 = int_to_ptr.vmem [resolvable:$true] %s16_s13 }
   0x4   :  { %s1051_s17 = smov 128   ;;  %s1052_s18 = smov 8  }
   0x5   :  { %22 = dma.hbm_to_vmem [thread:$0]  %s15_s11, 2304, %s17_s13, [#allocation3], %s1051_s17, %s1051_s17, %s1052_s18  }
   0x6   :  { %s34_s19 = sshll.u32 %s33_s16, 4  ;;  %s1053_s20 = smov [#allocation5]   ;;  %s35_s19 = int_to_ptr.hbm [resolvable:$true] %s34_s19 }
   0x7   :  { %s36_s21 = sshll.u32 %s1053_s20, 4  ;;  %s37_s21 = int_to_ptr.vmem [resolvable:$true] %s36_s21 }
   0x8   :  { %42 = dma.hbm_to_vmem [thread:$0]  %s35_s19, 768, %s37_s21, [#allocation6], %s1051_s17, %s1051_s17, %s1052_s18  }
   0x9   :  { %1044 = dma.done.wait [#allocation3], 2304  }
   0xa   :  { %1045 = vsyncadd [#allocation3], 4294964992 }
   0xb   :  { %1046 = dma.done.wait [#allocation6], 768  }
   0xc   :  { %1047 = vsyncadd [#allocation6], 4294966528  ;;  %v1054_v0 = vmov 3.0   ;;  %v55_v1 = vlaneseq  ;;  %v66_v3 = vld [vmem:[#allocation2] sm:$0xff]  ;;  %v68_v4 = vld [vmem:[#allocation2 + $0x10] sm:$0xff]  ;;  %s1055_s0 = smov 1  }
   0xd   :  { %958 = vrcp.f32 %v1054_v0  ;;  %v67_v6 = vld [vmem:[#allocation2 + $0x8] sm:$0xff]  ;;  %v69_v7 = vld [vmem:[#allocation2 + $0x18] sm:$0xff]  ;;  %v70_v8 = vld [vmem:[#allocation2 + $0x20] sm:$0xff]  ;;  %v72_v9 = vadd.f32 %v68_v4, %v66_v3  ;;  %s1056_s1 = smov 127   ;;  %s1057_s22 = smov [#allocation7]  }
   0xe   :  { %v74_v10 = vadd.f32 %v69_v7, %v67_v6  ;;  %v87_v11 = vld [vmem:[#allocation2 + $0x38] sm:$0xff]  ;;  %v89_v12 = vld [vmem:[#allocation2 + $0x48] sm:$0xff]  ;;  %v86_v15 = vld [vmem:[#allocation2 + $0x30] sm:$0xff]  ;;  %v1086_v17 = vshrl.u32 %v55_v1, 7  ;;  %s932_s23 = sshll.u32 %s1057_s22, 4  ;;  %s934_s26 = sshll.u32 %s2239_s2, 4  ;;  %s933_s23 = int_to_ptr.vmem [resolvable:$true] %s932_s23  ;;  %s935_s26 = int_to_ptr.hbm [resolvable:$true] %s934_s26 }
   0xf   :  { %v71_v14 = vld [vmem:[#allocation2 + $0x28] sm:$0xff]  ;;  %v88_v16 = vld [vmem:[#allocation2 + $0x40] sm:$0xff]  ;;  %v90_v18 = vld [vmem:[#allocation2 + $0x50] sm:$0xff]  ;;  %v94_v21 = vadd.f32 %v89_v12, %v87_v11  ;;  %v73_v22 = vadd.f32 %v72_v9, %v70_v8 }
  0x10   :  { %v92_v19 = vadd.f32 %v88_v16, %v86_v15  ;;  %v75_v23 = vadd.f32 %v74_v10, %v71_v14  ;;  %v91_v24 = vld [vmem:[#allocation2 + $0x58] sm:$0xff]  ;;  %v1089_v27 = vadd.s32 8, %v1086_v17  ;;  %vm60_vm1 = vcmp.ge.s32.totalorder %v1086_v17, 1 }
  0x11   :  { %v95_v29 = vadd.f32 %v94_v21, %v91_v24  ;;  %vm116_vm3 = vcmp.lt.s32.totalorder %v1086_v17, 7  ;;  %vm123_vm4 = vcmp.lt.s32.totalorder %v1086_v17, 1 }
  0x12   :  { %v93_v26 = vadd.f32 %v92_v19, %v90_v18  ;;  %vm63_vm2 = vcmp.lt.s32.totalorder %v1089_v27, 15  ;;  %v368_v19 = vld [vmem:[#allocation2 + $0x60] sm:$0xff] }
  0x13   :  { %v959_v2 = vpop.eup %958 }
  0x14   :  { %v77_v5 = vmul.f32 3.0, %v959_v2  ;;  %vm81_vm0 = vweird.f32 %v959_v2 }
  0x16   :  { %v78_v13 = vsub.f32 1.0, %v77_v5 }
  0x18   :  { %v79_v20 = vmul.f32 %v959_v2, %v78_v13 }
  0x1a   :  { %v80_v25 = vadd.f32 %v959_v2, %v79_v20  ;;  %v370_v20 = vld [vmem:[#allocation2 + $0x70] sm:$0xff] }
  0x1c   :  { %v1091_v28 = vsel %vm81_vm0, %v959_v2, %v80_v25 }
  0x1d   :  { %v83_v30 = vmul.f32 %v1091_v28, %v73_v22  ;;  %v84_v31 = vmul.f32 %v1091_v28, %v75_v23  ;;  %v1097_v32 = vmul.f32 %v93_v26, %v1091_v28  ;;  %v1105_v37 = vmul.f32 %v95_v29, %v1091_v28 }
  0x1f   :  { %104 = vrot.lane.b32.xlu1 %v83_v30, %s1055_s0  ;;  %98 = vrot.lane.b32.xlu0 %v83_v30, %s1056_s1  ;;  %v114_v33 = vrot.slane %v83_v30, 1  ;;  %v115_v34 = vrot.slane %v84_v31, 1  ;;  %v121_v35 = vrot.slane %v83_v30, 7  ;;  %v122_v36 = vrot.slane %v84_v31, 7 }
  0x20   :  { %v1120_v46 = vsub.f32 %v1097_v32, %v83_v30  ;;  %v1123_v47 = vsub.f32 %v1105_v37, %v84_v31  ;;  %v396_v21 = vrot.slane %v1097_v32, 1  ;;  %v397_v22 = vrot.slane %v1105_v37, 1 }
  0x21   :  { %v117_v38 = vsel %vm116_vm3, %v114_v33, %v115_v34  ;;  %v118_v39 = vsel %vm116_vm3, %v115_v34, %v114_v33  ;;  %v124_v40 = vsel %vm123_vm4, %v121_v35, %v122_v36  ;;  %v125_v41 = vsel %vm123_vm4, %v122_v36, %v121_v35  ;;  %v372_v36 = vld [vmem:[#allocation2 + $0x80] sm:$0xff] }
  0x22   :  { %v120_v42 = vsel %vm63_vm2, %v118_v39, 0.0  ;;  %v126_v43 = vsel %vm60_vm1, %v125_v41, 0.0  ;;  %v402_v23 = vrot.slane %v1097_v32, 7  ;;  %v403_v24 = vrot.slane %v1105_v37, 7 }
  0x23   :  { %v128_v44 = vsub.f32 %v117_v38, %v126_v43  ;;  %v129_v45 = vsub.f32 %v120_v42, %v124_v40  ;;  %v398_v25 = vsel %vm116_vm3, %v396_v21, %v397_v22  ;;  %v399_v26 = vsel %vm116_vm3, %v397_v22, %v396_v21  ;;  %v369_v43 = vld [vmem:[#allocation2 + $0x68] sm:$0xff] }
  0x24   :  { %v404_v29 = vsel %vm123_vm4, %v402_v23, %v403_v24  ;;  %v405_v30 = vsel %vm123_vm4, %v403_v24, %v402_v23  ;;  %v374_v33 = vadd.f32 %v370_v20, %v368_v19  ;;  %v401_v34 = vsel %vm63_vm2, %v399_v26, 0.0 }
  0x25   :  { %v1125_v48 = vmul.f32 0.5, %v128_v44  ;;  %v1127_v49 = vmul.f32 0.5, %v129_v45  ;;  %v406_v35 = vsel %vm60_vm1, %v405_v30, 0.0  ;;  %v409_v39 = vsub.f32 %v401_v34, %v404_v29  ;;  %v371_v44 = vld [vmem:[#allocation2 + $0x78] sm:$0xff] }
  0x26   :  { %v408_v38 = vsub.f32 %v398_v25, %v406_v35  ;;  %v375_v42 = vadd.f32 %v374_v33, %v372_v36 }
  0x27   :  { %106 = vrot.lane.b32.xlu1 %v84_v31, %s1055_s0  ;;  %100 = vrot.lane.b32.xlu0 %v84_v31, %s1056_s1  ;;  %v168_v50 = vmul.f32 %v1125_v48, %v1125_v48  ;;  %v169_v51 = vmul.f32 %v1127_v49, %v1127_v49  ;;  %v270_v52 = vmul.f32 %v1120_v46, %v1125_v48  ;;  %v1201_v41 = vmul.f32 0.5, %v409_v39 }
  0x28   :  { %v271_v53 = vmul.f32 %v1123_v47, %v1127_v49  ;;  %v1199_v40 = vmul.f32 0.5, %v408_v38 }
  0x29   :  { %v170_v54 = vrot.slane %v168_v50, 7  ;;  %v171_v55 = vrot.slane %v169_v51, 7  ;;  %v178_v56 = vrot.slane %v168_v50, 1  ;;  %v179_v57 = vrot.slane %v169_v51, 1 }
  0x2a   :  { %v272_v58 = vrot.slane %v270_v52, 7  ;;  %v273_v59 = vrot.slane %v271_v53, 7  ;;  %v280_v60 = vrot.slane %v270_v52, 1  ;;  %v281_v61 = vrot.slane %v271_v53, 1 }
  0x2b   :  { %v172_v62 = vsel %vm123_vm4, %v170_v54, %v171_v55  ;;  %v181_v63 = vsel %vm116_vm3, %v179_v57, %v178_v56  ;;  %v173_v0 = vsel %vm123_vm4, %v171_v55, %v170_v54  ;;  %v180_v9 = vsel %vm116_vm3, %v178_v56, %v179_v57 }
  0x2c   :  { %v177_v2 = vadd.f32 %v172_v62, %v169_v51  ;;  %v183_v3 = vsel %vm63_vm2, %v181_v63, 0.0  ;;  %v174_v4 = vsel %vm60_vm1, %v173_v0, 0.0  ;;  %v274_v5 = vsel %vm123_vm4, %v272_v58, %v273_v59 }
  0x2d   :  { %v283_v7 = vsel %vm116_vm3, %v281_v61, %v280_v60  ;;  %v176_v8 = vadd.f32 %v174_v4, %v168_v50  ;;  %v279_v10 = vadd.f32 %v274_v5, %v271_v53  ;;  %v275_v12 = vsel %vm123_vm4, %v273_v59, %v272_v58  ;;  %v373_v53 = vld [vmem:[#allocation2 + $0x88] sm:$0xff] }
  0x2e   :  { %v1151_v6 = vadd.f32 %v183_v3, %v177_v2  ;;  %v285_v11 = vsel %vm63_vm2, %v283_v7, 0.0  ;;  %v276_v15 = vsel %vm60_vm1, %v275_v12, 0.0  ;;  %v282_v18 = vsel %vm116_vm3, %v280_v60, %v281_v61 }
  0x2f   :  { %382 = vrot.lane.b32.xlu1 %v1105_v37, %s1056_s1  ;;  %380 = vrot.lane.b32.xlu0 %v1097_v32, %s1056_s1  ;;  %v1167_v13 = vadd.f32 %v180_v9, %v176_v8  ;;  %v1169_v14 = vadd.f32 %v285_v11, %v279_v10  ;;  %v278_v16 = vadd.f32 %v276_v15, %v270_v52 }
  0x30   :  { %196 = vrot.lane.b32.xlu2 %v1151_v6, %s1056_s1  ;;  %v448_v45 = vmul.f32 %v1199_v40, %v1199_v40  ;;  %v449_v50 = vmul.f32 %v1201_v41, %v1201_v41  ;;  %v1214_v51 = vmul.f32 %v375_v42, %v1091_v28  ;;  %v376_v52 = vadd.f32 %v371_v44, %v369_v43 }
  0x31   :  { %v1193_v31 = vadd.f32 %v282_v18, %v278_v16 }
  0x32   :  { %v450_v54 = vrot.slane %v448_v45, 7  ;;  %v451_v55 = vrot.slane %v449_v50, 7  ;;  %v377_v56 = vadd.f32 %v376_v52, %v373_v53  ;;  %v458_v60 = vrot.slane %v448_v45, 1 }
  0x33   :  { %v459_v61 = vrot.slane %v449_v50, 1  ;;  %v1253_v7 = vsub.f32 %v1214_v51, %v1097_v32  ;;  %v676_v12 = vrot.slane %v1214_v51, 1 }
  0x34   :  { %v453_v57 = vsel %vm123_vm4, %v451_v55, %v450_v54  ;;  %v1225_v58 = vmul.f32 %v377_v56, %v1091_v28  ;;  %v452_v2 = vsel %vm123_vm4, %v450_v54, %v451_v55 }
  0x35   :  { %v454_v59 = vsel %vm60_vm1, %v453_v57, 0.0  ;;  %v460_v63 = vsel %vm116_vm3, %v458_v60, %v459_v61  ;;  %v461_v3 = vsel %vm116_vm3, %v459_v61, %v458_v60  ;;  %v457_v4 = vadd.f32 %v452_v2, %v449_v50 }
  0x36   :  { %v456_v62 = vadd.f32 %v454_v59, %v448_v45  ;;  %v463_v5 = vsel %vm63_vm2, %v461_v3, 0.0  ;;  %v1257_v8 = vsub.f32 %v1225_v58, %v1105_v37  ;;  %v1263_v10 = vmul.f32 %v1253_v7, %v1199_v40 }
  0x37   :  { %194 = vrot.lane.b32.xlu1 %v1167_v13, %s1056_s1  ;;  %188 = vrot.lane.b32.xlu0 %v1151_v6, %s1055_s0  ;;  %v1259_v9 = vadd.f32 %v463_v5, %v457_v4  ;;  %v677_v15 = vrot.slane %v1225_v58, 1  ;;  %v683_v16 = vrot.slane %v1225_v58, 7  ;;  %v1343_v4 = vand.u32 127, %v55_v1 }
  0x38   :  { %298 = vrot.lane.b32.xlu2 %v1169_v14, %s1056_s1  ;;  %v1237_v0 = vadd.f32 %v460_v63, %v456_v62  ;;  %v1267_v11 = vmul.f32 %v1257_v8, %v1201_v41  ;;  %v2241_v29 = vrot.slane %v1263_v10, 1 }
  0x39   :  { %v678_v19 = vsel %vm116_vm3, %v676_v12, %v677_v15  ;;  %v679_v20 = vsel %vm116_vm3, %v677_v15, %v676_v12  ;;  %vm64_vm5 = vcmp.ge.s32.totalorder %v1343_v4, 1  ;;  %vm65_vm6 = vcmp.lt.s32.totalorder %v1343_v4, 127 }
  0x3a   :  { %v2243_v18 = vrot.slane %v1267_v11, 7  ;;  %v681_v24 = vsel %vm63_vm2, %v679_v20, 0.0  ;;  %v2240_v30 = vrot.slane %v1267_v11, 1 }
  0x3c   :  { %v562_v36 = vsel %vm116_vm3, %v2241_v29, %v2240_v30 }
  0x3f   :  { %296 = vrot.lane.b32.xlu1 %v1193_v31, %s1056_s1  ;;  %290 = vrot.lane.b32.xlu0 %v1169_v14, %s1055_s0 }
  0x40   :  { %186 = vrot.lane.b32.xlu2 %v1167_v13, %s1055_s0 }
  0x47   :  { %660 = vrot.lane.b32.xlu1 %v1214_v51, %s1056_s1  ;;  %388 = vrot.lane.b32.xlu0 %v1105_v37, %s1055_s0  ;;  %v2242_v37 = vrot.slane %v1263_v10, 7 }
  0x48   :  { %288 = vrot.lane.b32.xlu2 %v1193_v31, %s1055_s0 }
  0x49   :  { %v555_v23 = vsel %vm123_vm4, %v2243_v18, %v2242_v37 }
  0x4a   :  { %v556_v26 = vsel %vm60_vm1, %v555_v23, 0.0 }
  0x4b   :  { %v558_v34 = vadd.f32 %v556_v26, %v1263_v10 }
  0x4d   :  { %v1310_v39 = vadd.f32 %v562_v36, %v558_v34 }
  0x4f   :  { %668 = vrot.lane.b32.xlu1 %v1225_v58, %s1055_s0  ;;  %666 = vrot.lane.b32.xlu0 %v1214_v51, %s1055_s0 }
  0x50   :  { %386 = vrot.lane.b32.xlu2 %v1097_v32, %s1055_s0  ;;  %v682_v32 = vrot.slane %v1214_v51, 7 }
  0x52   :  { %v684_v21 = vsel %vm123_vm4, %v682_v32, %v683_v16  ;;  %v685_v22 = vsel %vm123_vm4, %v683_v16, %v682_v32 }
  0x53   :  { %v686_v25 = vsel %vm60_vm1, %v685_v22, 0.0  ;;  %v689_v35 = vsub.f32 %v681_v24, %v684_v21 }
  0x54   :  { %v688_v33 = vsub.f32 %v678_v19, %v686_v25 }
  0x55   :  { %v1312_v42 = vmul.f32 0.5, %v689_v35 }
  0x56   :  { %v1308_v38 = vmul.f32 0.5, %v688_v33 }
  0x57   :  { %466 = vrot.lane.b32.xlu0 %v1237_v0, %s1055_s0  ;;  %468 = vrot.lane.b32.xlu1 %v1259_v9, %s1055_s0  ;;  %v729_v44 = vmul.f32 %v1312_v42, %v1312_v42 }
  0x58   :  { %662 = vrot.lane.b32.xlu2 %v1225_v58, %s1056_s1  ;;  %v728_v43 = vmul.f32 %v1308_v38, %v1308_v38 }
  0x59   :  { %v731_v50 = vrot.slane %v729_v44, 7  ;;  %v739_v53 = vrot.slane %v729_v44, 1 }
  0x5a   :  { %v730_v45 = vrot.slane %v728_v43, 7  ;;  %v738_v52 = vrot.slane %v728_v43, 1 }
  0x5c   :  { %v732_v54 = vsel %vm123_vm4, %v730_v45, %v731_v50  ;;  %v741_v55 = vsel %vm116_vm3, %v739_v53, %v738_v52  ;;  %v733_v56 = vsel %vm123_vm4, %v731_v50, %v730_v45  ;;  %v740_v61 = vsel %vm116_vm3, %v738_v52, %v739_v53 }
  0x5d   :  { %v737_v57 = vadd.f32 %v732_v54, %v729_v44  ;;  %v743_v59 = vsel %vm63_vm2, %v741_v55, 0.0  ;;  %v734_v60 = vsel %vm60_vm1, %v733_v56, 0.0 }
  0x5e   :  { %v736_v62 = vadd.f32 %v734_v60, %v728_v43 }
  0x5f   :  { %476 = vrot.lane.b32.xlu0 %v1259_v9, %s1056_s1  ;;  %v1332_v63 = vadd.f32 %v743_v59, %v737_v57 }
  0x60   :  { %474 = vrot.lane.b32.xlu2 %v1237_v0, %s1056_s1  ;;  %v1334_v2 = vadd.f32 %v740_v61, %v736_v62 }
  0x61   :  { %748 = vrot.lane.b32.xlu1 %v1332_v63, %s1055_s0 }
  0x67   :  { %568 = vrot.lane.b32.xlu0 %v1310_v39, %s1055_s0 }
  0x6f   :  { %746 = vrot.lane.b32.xlu0 %v1334_v2, %s1055_s0 }
  0x8a   :  { %v1340_v3 = vpop.permute.xlu2 %196 }
  0x91   :  { %v105_v5 = vpop.permute.xlu1 %104  ;;  %v99_v12 = vpop.permute.xlu0 %98 }
  0x92   :  { %v108_v15 = vsel %vm64_vm5, %v105_v5, 0.0  ;;  %v102_v32 = vsel %vm65_vm6, %v99_v12, 0.0  ;;  %v1351_v16 = vpop.permute.xlu2 %298 }
  0x93   :  { %v110_v19 = vsub.f32 %v102_v32, %v108_v15 }
  0x95   :  { %v112_v20 = vmul.f32 0.5, %v110_v19 }
  0x97   :  { %v1357_v26 = vmul.f32 %v112_v20, %v112_v20  ;;  %v1360_v33 = vmul.f32 %v1125_v48, %v112_v20  ;;  %v1373_v50 = vmul.f32 %v1120_v46, %v112_v20 }
  0x99   :  { %v107_v21 = vpop.permute.xlu1 %106  ;;  %v101_v22 = vpop.permute.xlu0 %100  ;;  %v136_v44 = vrot.slane %v1357_v26, 7  ;;  %v204_v45 = vrot.slane %v1360_v33, 7  ;;  %v2244_v57 = vrot.slane %v1360_v33, 1  ;;  %v238_v19 = vrot.slane %v1373_v50, 7 }
  0x9a   :  { %v109_v1 = vsel %vm64_vm5, %v107_v21, 0.0  ;;  %v103_v23 = vsel %vm65_vm6, %v101_v22, 0.0  ;;  %v187_v24 = vpop.permute.xlu2 %186 }
  0x9b   :  { %v111_v25 = vsub.f32 %v103_v23, %v109_v1  ;;  %v246_v1 = vrot.slane %v1373_v50, 1 }
  0x9d   :  { %v113_v34 = vmul.f32 0.5, %v111_v25 }
  0x9f   :  { %v1362_v35 = vmul.f32 %v113_v34, %v113_v34  ;;  %v1365_v36 = vmul.f32 %v1127_v49, %v113_v34  ;;  %v1368_v43 = vmul.f32 %v1123_v47, %v113_v34  ;;  %v144_v49 = vrot.slane %v1357_v26, 1 }
  0xa0   :  { %v190_v47 = vsel %vm64_vm5, %v187_v24, 0.0 }
  0xa1   :  { %v137_v52 = vrot.slane %v1362_v35, 7  ;;  %v2256_v48 = vrot.slane %v1365_v36, 7  ;;  %v1377_v53 = vpop.permute.xlu1 %382  ;;  %v381_v54 = vpop.permute.xlu0 %380  ;;  %v145_v55 = vrot.slane %v1362_v35, 1  ;;  %v2245_v46 = vrot.slane %v1365_v36, 1 }
  0xa2   :  { %v289_v56 = vpop.permute.xlu2 %288  ;;  %v239_v59 = vrot.slane %v1368_v43, 7  ;;  %v247_v32 = vrot.slane %v1368_v43, 1  ;;  %v192_v23 = vadd.f32 %v190_v47, %v1167_v13 }
  0xa3   :  { %v138_v60 = vsel %vm123_vm4, %v136_v44, %v137_v52  ;;  %v147_v61 = vsel %vm116_vm3, %v145_v55, %v144_v49  ;;  %v206_v62 = vsel %vm123_vm4, %v204_v45, %v2256_v48  ;;  %v215_v20 = vsel %vm116_vm3, %v2245_v46, %v2244_v57 }
  0xa4   :  { %v143_v5 = vadd.f32 %v138_v60, %v1362_v35  ;;  %v149_v12 = vsel %vm63_vm2, %v147_v61, 0.0  ;;  %v211_v15 = vadd.f32 %v206_v62, %v1365_v36  ;;  %v217_v22 = vsel %vm63_vm2, %v215_v20, 0.0 }
  0xa5   :  { %v240_v25 = vsel %vm123_vm4, %v238_v19, %v239_v59  ;;  %v249_v13 = vsel %vm116_vm3, %v247_v32, %v246_v1  ;;  %v199_v20 = vsel %vm65_vm6, %v1340_v3, 0.0  ;;  %v384_v3 = vsel %vm65_vm6, %v381_v54, 0.0 }
  0xa6   :  { %v1416_v21 = vadd.f32 %v149_v12, %v143_v5  ;;  %v1422_v24 = vadd.f32 %v217_v22, %v211_v15  ;;  %v245_v62 = vadd.f32 %v240_v25, %v1368_v43  ;;  %v251_v15 = vsel %vm63_vm2, %v249_v13, 0.0  ;;  %v648_v25 = vld [vmem:[#allocation5] sm:$0xff] }
  0xa7   :  { %v292_v22 = vsel %vm64_vm5, %v289_v56, 0.0  ;;  %v301_v54 = vsel %vm65_vm6, %v1351_v16, 0.0 }
  0xa8   :  { %162 = vrot.lane.b32.xlu1 %v1416_v21, %s1056_s1  ;;  %154 = vrot.lane.b32.xlu2 %v1416_v21, %s1055_s0  ;;  %v1459_v29 = vadd.f32 %v251_v15, %v245_v62 }
  0xa9   :  { %230 = vrot.lane.b32.xlu0 %v1422_v24, %s1056_s1  ;;  %v195_v34 = vpop.permute.xlu1 %194  ;;  %v189_v47 = vpop.permute.xlu0 %188 }
  0xaa   :  { %v198_v60 = vsel %vm65_vm6, %v195_v34, 0.0  ;;  %v191_v61 = vsel %vm64_vm5, %v189_v47, 0.0  ;;  %v387_v34 = vpop.permute.xlu2 %386  ;;  %v649_v47 = vld [vmem:[#allocation5 + $0x8] sm:$0xff] }
  0xab   :  { %v1447_v5 = vadd.f32 %v198_v60, %v192_v23  ;;  %v193_v12 = vadd.f32 %v191_v61, %v1151_v6  ;;  %v651_v23 = vld [vmem:[#allocation5 + $0x18] sm:$0xff]  ;;  %v650_v60 = vld [vmem:[#allocation5 + $0x10] sm:$0xff]  ;;  %v294_v6 = vadd.f32 %v292_v22, %v1193_v31  ;;  %v390_v13 = vsel %vm64_vm5, %v387_v34, 0.0  ;;  %v652_v22 = vld [vmem:[#allocation5 + $0x20] sm:$0xff] }
  0xac   :  { %v656_v62 = vadd.f32 %v651_v23, %v649_v47  ;;  %v392_v15 = vsub.f32 %v384_v3, %v390_v13 }
  0xad   :  { %v1457_v30 = vadd.f32 %v199_v20, %v193_v12  ;;  %v654_v12 = vadd.f32 %v650_v60, %v648_v25  ;;  %v653_v20 = vld [vmem:[#allocation5 + $0x28] sm:$0xff]  ;;  %v385_v60 = vsel %vm65_vm6, %v1377_v53, 0.0 }
  0xae   :  { %v657_v57 = vadd.f32 %v656_v62, %v653_v20  ;;  %v394_v23 = vmul.f32 0.5, %v392_v15 }
  0xaf   :  { %v655_v47 = vadd.f32 %v654_v12, %v652_v22 }
  0xb0   :  { %222 = vrot.lane.b32.xlu1 %v1422_v24, %s1055_s0  ;;  %256 = vrot.lane.b32.xlu2 %v1459_v29, %s1055_s0  ;;  %v1489_v3 = vmul.f32 %v394_v23, %v394_v23  ;;  %v1492_v16 = vmul.f32 %v1199_v40, %v394_v23 }
  0xb1   :  { %v297_v56 = vpop.permute.xlu1 %296  ;;  %v291_v61 = vpop.permute.xlu0 %290 }
  0xb2   :  { %v300_v31 = vsel %vm65_vm6, %v297_v56, 0.0  ;;  %v293_v37 = vsel %vm64_vm5, %v291_v61, 0.0  ;;  %v663_v62 = vpop.permute.xlu2 %662 }
  0xb3   :  { %v1472_v34 = vadd.f32 %v300_v31, %v294_v6  ;;  %v295_v18 = vadd.f32 %v293_v37, %v1169_v14  ;;  %v659_v14 = vmul.f32 %v657_v57, %v1091_v28  ;;  %v658_v37 = vmul.f32 %v655_v47, %v1091_v28 }
  0xb4   :  { %v416_v57 = vrot.slane %v1489_v3, 7  ;;  %v2255_v28 = vrot.slane %v1492_v16, 7  ;;  %v2249_v47 = vrot.slane %v1492_v16, 1 }
  0xb5   :  { %v1480_v25 = vadd.f32 %v301_v54, %v295_v18  ;;  %v1495_v18 = vmul.f32 %v1253_v7, %v394_v23  ;;  %v1500_v12 = vsub.f32 %v659_v14, %v1225_v58  ;;  %v1506_v40 = vsub.f32 %v658_v37, %v1214_v51 }
  0xb6   :  { %v665_v58 = vsel %vm65_vm6, %v663_v62, 0.0  ;;  %v2252_v51 = vrot.slane %v1489_v3, 1 }
  0xb7   :  { %v2251_v15 = vrot.slane %v1495_v18, 7  ;;  %v2246_v54 = vrot.slane %v1495_v18, 1 }
  0xb8   :  { %264 = vrot.lane.b32.xlu1 %v1459_v29, %s1056_s1 }
  0xb9   :  { %v661_v6 = vpop.permute.xlu1 %660  ;;  %v389_v13 = vpop.permute.xlu0 %388 }
  0xba   :  { %v391_v56 = vsel %vm64_vm5, %v389_v13, 0.0  ;;  %v664_v22 = vsel %vm65_vm6, %v661_v6, 0.0 }
  0xbb   :  { %v393_v61 = vsub.f32 %v385_v60, %v391_v56 }
  0xbd   :  { %v395_v53 = vmul.f32 0.5, %v393_v61 }
  0xbf   :  { %v1508_v7 = vmul.f32 %v395_v53, %v395_v53  ;;  %v1511_v31 = vmul.f32 %v1201_v41, %v395_v53  ;;  %v1514_v20 = vmul.f32 %v1257_v8, %v395_v53 }
  0xc1   :  { %v417_v23 = vrot.slane %v1508_v7, 7  ;;  %v2254_v41 = vrot.slane %v1511_v31, 7  ;;  %v2248_v60 = vrot.slane %v1514_v20, 7  ;;  %v669_v8 = vpop.permute.xlu1 %668  ;;  %v667_v13 = vpop.permute.xlu0 %666  ;;  %v2247_v14 = vrot.slane %v1514_v20, 1 }
  0xc2   :  { %v671_v37 = vsel %vm64_vm5, %v669_v8, 0.0  ;;  %v670_v6 = vsel %vm64_vm5, %v667_v13, 0.0  ;;  %v2250_v56 = vrot.slane %v1511_v31, 1  ;;  %v2253_v61 = vrot.slane %v1508_v7, 1 }
  0xc3   :  { %v673_v62 = vsub.f32 %v665_v58, %v671_v37  ;;  %v672_v53 = vsub.f32 %v664_v22, %v670_v6  ;;  %v520_v46 = vsel %vm123_vm4, %v2251_v15, %v2248_v60  ;;  %v529_v8 = vsel %vm116_vm3, %v2247_v14, %v2246_v54 }
  0xc4   :  { %v525_v13 = vadd.f32 %v520_v46, %v1514_v20  ;;  %v531_v58 = vsel %vm63_vm2, %v529_v8, 0.0  ;;  %v486_v22 = vsel %vm123_vm4, %v2255_v28, %v2254_v41  ;;  %v495_v37 = vsel %vm116_vm3, %v2250_v56, %v2249_v47 }
  0xc5   :  { %v1560_v6 = vmul.f32 0.5, %v673_v62  ;;  %v1562_v46 = vmul.f32 0.5, %v672_v53  ;;  %v491_v8 = vadd.f32 %v486_v22, %v1511_v31  ;;  %v497_v54 = vsel %vm63_vm2, %v495_v37, 0.0 }
  0xc6   :  { %v1567_v14 = vadd.f32 %v531_v58, %v525_v13  ;;  %v418_v60 = vsel %vm123_vm4, %v416_v57, %v417_v23  ;;  %v241_v62 = vsel %vm123_vm4, %v239_v59, %v238_v19  ;;  %v427_v13 = vsel %vm116_vm3, %v2253_v61, %v2252_v51 }
  0xc7   :  { %v763_v53 = vmul.f32 %v1312_v42, %v1560_v6  ;;  %v762_v58 = vmul.f32 %v1308_v38, %v1562_v46  ;;  %v1591_v22 = vadd.f32 %v497_v54, %v491_v8  ;;  %v423_v59 = vadd.f32 %v418_v60, %v1508_v7 }
  0xc8   :  { %536 = vrot.lane.b32.xlu0 %v1567_v14, %s1055_s0  ;;  %v797_v37 = vmul.f32 %v1500_v12, %v1560_v6  ;;  %v796_v47 = vmul.f32 %v1506_v40, %v1562_v46  ;;  %v242_v56 = vsel %vm60_vm1, %v241_v62, 0.0  ;;  %v429_v54 = vsel %vm63_vm2, %v427_v13, 0.0 }
  0xc9   :  { %v765_v19 = vrot.slane %v763_v53, 7  ;;  %v764_v15 = vrot.slane %v762_v58, 7  ;;  %510 = vrot.lane.b32.xlu1 %v1591_v22, %s1056_s1  ;;  %v772_v8 = vrot.slane %v762_v58, 1  ;;  %v1604_v51 = vadd.f32 %v429_v54, %v423_v59 }
  0xca   :  { %v773_v60 = vrot.slane %v763_v53, 1  ;;  %v244_v61 = vadd.f32 %v242_v56, %v1373_v50  ;;  %v139_v62 = vsel %vm123_vm4, %v137_v52, %v136_v44  ;;  %v799_v28 = vrot.slane %v797_v37, 7 }
  0xcb   :  { %v766_v41 = vsel %vm123_vm4, %v764_v15, %v765_v19  ;;  %v798_v48 = vrot.slane %v796_v47, 7  ;;  %434 = vrot.lane.b32.xlu2 %v1604_v51, %s1055_s0  ;;  %v419_v54 = vsel %vm123_vm4, %v417_v23, %v416_v57  ;;  %v248_v44 = vsel %vm116_vm3, %v246_v1, %v247_v32 }
  0xcc   :  { %v771_v13 = vadd.f32 %v766_v41, %v763_v53  ;;  %v775_v59 = vsel %vm116_vm3, %v773_v60, %v772_v8  ;;  %v1633_v41 = vadd.f32 %v248_v44, %v244_v61  ;;  %v140_v53 = vsel %vm60_vm1, %v139_v62, 0.0 }
  0xcd   :  { %v777_v56 = vsel %vm63_vm2, %v775_v59, 0.0  ;;  %v420_v57 = vsel %vm60_vm1, %v419_v54, 0.0  ;;  %v800_v43 = vsel %vm123_vm4, %v798_v48, %v799_v28  ;;  %v806_v50 = vrot.slane %v796_v47, 1 }
  0xce   :  { %v1631_v52 = vadd.f32 %v777_v56, %v771_v13  ;;  %v805_v32 = vadd.f32 %v800_v43, %v797_v37  ;;  %v142_v1 = vadd.f32 %v140_v53, %v1357_v26  ;;  %v146_v23 = vsel %vm116_vm3, %v144_v49, %v145_v55 }
  0xcf   :  { %v807_v61 = vrot.slane %v797_v37, 1  ;;  %v767_v62 = vsel %vm123_vm4, %v765_v19, %v764_v15  ;;  %v422_v13 = vadd.f32 %v420_v57, %v1489_v3  ;;  %v774_v56 = vsel %vm116_vm3, %v772_v8, %v773_v60 }
  0xd0   :  { %782 = vrot.lane.b32.xlu0 %v1631_v52, %s1055_s0  ;;  %v768_v59 = vsel %vm60_vm1, %v767_v62, 0.0  ;;  %v801_v35 = vsel %vm123_vm4, %v799_v28, %v798_v48  ;;  %v2257_v26 = vrot.slane %v1365_v36, 7  ;;  %v2258_v37 = vrot.slane %v1492_v16, 7 }
  0xd1   :  { %254 = vrot.lane.b32.xlu1 %v1633_v41, %s1055_s0  ;;  %v809_v55 = vsel %vm116_vm3, %v807_v61, %v806_v50  ;;  %v770_v15 = vadd.f32 %v768_v59, %v762_v58  ;;  %v802_v19 = vsel %vm60_vm1, %v801_v35, 0.0  ;;  %v2259_v48 = vrot.slane %v1511_v31, 7 }
  0xd2   :  { %v207_v49 = vsel %vm123_vm4, %v2257_v26, %v204_v45  ;;  %v811_v8 = vsel %vm63_vm2, %v809_v55, 0.0  ;;  %v804_v60 = vadd.f32 %v802_v19, %v796_v47  ;;  %v808_v45 = vsel %vm116_vm3, %v806_v50, %v807_v61  ;;  %v467_v61 = vpop.permute.xlu0 %466 }
  0xd3   :  { %442 = vrot.lane.b32.xlu2 %v1604_v51, %s1056_s1  ;;  %v487_v28 = vsel %vm123_vm4, %v2259_v48, %v2258_v37  ;;  %v2260_v54 = vrot.slane %v1508_v7, 1  ;;  %v2261_v58 = vrot.slane %v1489_v3, 1  ;;  %v1689_v53 = vadd.f32 %v146_v23, %v142_v1  ;;  %v475_v23 = vpop.permute.xlu2 %474 }
  0xd4   :  { %v1691_v57 = vadd.f32 %v811_v8, %v805_v32  ;;  %v1693_v43 = vadd.f32 %v774_v56, %v770_v15  ;;  %v208_v47 = vsel %vm60_vm1, %v207_v49, 0.0  ;;  %v1699_v59 = vadd.f32 %v808_v45, %v804_v60 }
  0xd5   :  { %v426_v44 = vsel %vm116_vm3, %v2261_v58, %v2260_v54  ;;  %v488_v3 = vsel %vm60_vm1, %v487_v28, 0.0  ;;  %v210_v7 = vadd.f32 %v208_v47, %v1360_v33  ;;  %v695_v50 = vmul.f32 %v1560_v6, %v1560_v6 }
  0xd6   :  { %v1695_v62 = vadd.f32 %v426_v44, %v422_v13  ;;  %v694_v32 = vmul.f32 %v1562_v46, %v1562_v46  ;;  %v490_v1 = vadd.f32 %v488_v3, %v1492_v16  ;;  %v2262_v13 = vrot.slane %v1365_v36, 1 }
  0xd7   :  { %v2263_v56 = vrot.slane %v1360_v33, 1  ;;  %v2264_v26 = vrot.slane %v1495_v18, 7  ;;  %v2265_v6 = vrot.slane %v1514_v20, 7  ;;  %v478_v49 = vsel %vm65_vm6, %v475_v23, 0.0 }
  0xd8   :  { %160 = vrot.lane.b32.xlu0 %v1689_v53, %s1056_s1  ;;  %v470_v55 = vsel %vm64_vm5, %v467_v61, 0.0  ;;  %v2266_v36 = vrot.slane %v1511_v31, 1  ;;  %v2267_v33 = vrot.slane %v1492_v16, 1  ;;  %v697_v48 = vrot.slane %v695_v50, 7 }
  0xd9   :  { %432 = vrot.lane.b32.xlu1 %v1695_v62, %s1055_s0  ;;  %v214_v35 = vsel %vm116_vm3, %v2263_v56, %v2262_v13  ;;  %v521_v46 = vsel %vm123_vm4, %v2265_v6, %v2264_v26  ;;  %v472_v37 = vadd.f32 %v470_v55, %v1237_v0  ;;  %v696_v28 = vrot.slane %v694_v32, 7  ;;  %v469_v56 = vpop.permute.xlu1 %468 }
  0xda   :  { %v494_v15 = vsel %vm116_vm3, %v2267_v33, %v2266_v36  ;;  %v1737_v19 = vadd.f32 %v214_v35, %v210_v7  ;;  %v522_v60 = vsel %vm60_vm1, %v521_v46, 0.0  ;;  %v704_v31 = vrot.slane %v694_v32, 1 }
  0xdb   :  { %502 = vrot.lane.b32.xlu2 %v1591_v22, %s1055_s0  ;;  %v1740_v8 = vadd.f32 %v494_v15, %v490_v1  ;;  %v705_v45 = vrot.slane %v695_v50, 1  ;;  %v1746_v16 = vadd.f32 %v478_v49, %v472_v37  ;;  %v524_v54 = vadd.f32 %v522_v60, %v1495_v18 }
  0xdc   :  { %v698_v0 = vsel %vm123_vm4, %v696_v28, %v697_v48  ;;  %v699_v44 = vsel %vm123_vm4, %v697_v48, %v696_v28  ;;  %v2268_v47 = vrot.slane %v1514_v20, 1  ;;  %v2269_v3 = vrot.slane %v1495_v18, 1 }
  0xdd   :  { %v707_v58 = vsel %vm116_vm3, %v705_v45, %v704_v31  ;;  %v703_v1 = vadd.f32 %v698_v0, %v695_v50  ;;  %v700_v13 = vsel %vm60_vm1, %v699_v44, 0.0  ;;  %v477_v50 = vpop.permute.xlu0 %476  ;;  %v471_v26 = vsel %vm64_vm5, %v469_v56, 0.0 }
  0xde   :  { %v528_v7 = vsel %vm116_vm3, %v2269_v3, %v2268_v47  ;;  %v709_v61 = vsel %vm63_vm2, %v707_v58, 0.0  ;;  %v702_v18 = vadd.f32 %v700_v13, %v694_v32  ;;  %v479_v35 = vsel %vm65_vm6, %v477_v50, 0.0 }
  0xdf   :  { %v1765_v23 = vadd.f32 %v528_v7, %v524_v54  ;;  %v1775_v20 = vadd.f32 %v709_v61, %v703_v1  ;;  %v706_v6 = vsel %vm116_vm3, %v704_v31, %v705_v45  ;;  %v473_v46 = vadd.f32 %v471_v26, %v1259_v9 }
  0xe0   :  { %220 = vrot.lane.b32.xlu0 %v1737_v19, %s1055_s0  ;;  %v1786_v49 = vadd.f32 %v706_v6, %v702_v18  ;;  %v831_v9 = vmul.f32 %v1500_v12, %v1312_v42  ;;  %v830_v55 = vmul.f32 %v1506_v40, %v1308_v38  ;;  %v2270_v36 = vrot.slane %v1267_v11, 7 }
  0xe1   :  { %500 = vrot.lane.b32.xlu1 %v1740_v8, %s1055_s0  ;;  %v1790_v32 = vadd.f32 %v479_v35, %v473_v46  ;;  %v2271_v33 = vrot.slane %v1263_v10, 7  ;;  %v2272_v37 = vrot.slane %v1263_v10, 1  ;;  %v2273_v48 = vrot.slane %v1267_v11, 1  ;;  %v1845_v47 = vpop.permute.xlu1 %748 }
  0xe2   :  { %v832_v12 = vrot.slane %v830_v55, 7  ;;  %v833_v28 = vrot.slane %v831_v9, 7  ;;  %v840_v45 = vrot.slane %v830_v55, 1  ;;  %v841_v54 = vrot.slane %v831_v9, 1 }
  0xe3   :  { %544 = vrot.lane.b32.xlu2 %v1567_v14, %s1056_s1  ;;  %v554_v15 = vsel %vm123_vm4, %v2271_v33, %v2270_v36  ;;  %v563_v42 = vsel %vm116_vm3, %v2273_v48, %v2272_v37 }
  0xe4   :  { %v559_v38 = vadd.f32 %v554_v15, %v1267_v11  ;;  %v565_v40 = vsel %vm63_vm2, %v563_v42, 0.0  ;;  %v835_v10 = vsel %vm123_vm4, %v833_v28, %v832_v12  ;;  %v842_v0 = vsel %vm116_vm3, %v840_v45, %v841_v54 }
  0xe5   :  { %v836_v31 = vsel %vm60_vm1, %v835_v10, 0.0  ;;  %v1841_v58 = vpop.permute.xlu0 %568  ;;  %v834_v26 = vsel %vm123_vm4, %v832_v12, %v833_v28  ;;  %v843_v46 = vsel %vm116_vm3, %v841_v54, %v840_v45 }
  0xe6   :  { %v1829_v60 = vadd.f32 %v565_v40, %v559_v38  ;;  %v838_v11 = vadd.f32 %v836_v31, %v830_v55  ;;  %v839_v33 = vadd.f32 %v834_v26, %v831_v9  ;;  %v845_v37 = vsel %vm63_vm2, %v843_v46, 0.0 }
  0xe8   :  { %262 = vrot.lane.b32.xlu0 %v1633_v41, %s1056_s1  ;;  %v1843_v44 = vadd.f32 %v842_v0, %v838_v11  ;;  %v1886_v28 = vadd.f32 %v845_v37, %v839_v33 }
  0xe9   :  { %542 = vrot.lane.b32.xlu1 %v1765_v23, %s1056_s1 }
  0xeb   :  { %714 = vrot.lane.b32.xlu2 %v1775_v20, %s1055_s0 }
  0xed   :  { %v1853_v7 = vpop.permute.xlu0 %746 }
  0xf0   :  { %440 = vrot.lane.b32.xlu0 %v1695_v62, %s1056_s1 }
  0xf1   :  { %712 = vrot.lane.b32.xlu1 %v1786_v49, %s1055_s0 }
  0xf3   :  { %722 = vrot.lane.b32.xlu2 %v1775_v20, %s1056_s1 }
  0xf8   :  { %508 = vrot.lane.b32.xlu0 %v1740_v8, %s1056_s1 }
  0xf9   :  { %720 = vrot.lane.b32.xlu1 %v1786_v49, %s1056_s1 }
  0xfb   :  { %152 = vrot.lane.b32.xlu2 %v1689_v53, %s1055_s0 }
 0x100   :  { %754 = vrot.lane.b32.xlu0 %v1334_v2, %s1056_s1 }
 0x101   :  { %756 = vrot.lane.b32.xlu1 %v1332_v63, %s1056_s1 }
 0x102   :  { %v155_v3 = vpop.permute.xlu2 %154 }
 0x103   :  { %228 = vrot.lane.b32.xlu2 %v1737_v19, %s1056_s1  ;;  %v157_v61 = vsel %vm64_vm5, %v155_v3, 0.0 }
 0x104   :  { %v159_v50 = vadd.f32 %v157_v61, %v1416_v21 }
 0x108   :  { %790 = vrot.lane.b32.xlu0 %v1631_v52, %s1056_s1 }
 0x109   :  { %570 = vrot.lane.b32.xlu1 %v1829_v60, %s1055_s0 }
 0x10a   :  { %v257_v13 = vpop.permute.xlu2 %256 }
 0x10b   :  { %534 = vrot.lane.b32.xlu2 %v1765_v23, %s1055_s0  ;;  %v259_v48 = vsel %vm64_vm5, %v257_v13, 0.0 }
 0x110   :  { %816 = vrot.lane.b32.xlu0 %v1691_v57, %s1055_s0 }
 0x111   :  { %848 = vrot.lane.b32.xlu1 %v1843_v44, %s1055_s0 }
 0x113   :  { %780 = vrot.lane.b32.xlu2 %v1693_v43, %s1055_s0 }
 0x118   :  { %576 = vrot.lane.b32.xlu0 %v1310_v39, %s1056_s1 }
 0x119   :  { %578 = vrot.lane.b32.xlu1 %v1829_v60, %s1056_s1 }
 0x11a   :  { %v163_v1 = vpop.permute.xlu1 %162 }
 0x11b   :  { %788 = vrot.lane.b32.xlu2 %v1693_v43, %s1056_s1  ;;  %v165_v18 = vsel %vm65_vm6, %v163_v1, 0.0  ;;  %v231_v56 = vpop.permute.xlu0 %230 }
 0x11c   :  { %v167_v55 = vadd.f32 %v165_v18, %v159_v50  ;;  %v233_v21 = vsel %vm65_vm6, %v231_v56, 0.0 }
 0x11e   :  { %v305_v17 = vmul.f32 %v1457_v30, %v167_v55 }
 0x120   :  { %824 = vrot.lane.b32.xlu0 %v1691_v57, %s1056_s1 }
 0x121   :  { %856 = vrot.lane.b32.xlu1 %v1843_v44, %s1056_s1 }
 0x122   :  { %v223_v35 = vpop.permute.xlu1 %222 }
 0x123   :  { %v225_v6 = vsel %vm64_vm5, %v223_v35, 0.0  ;;  %814 = vrot.lane.b32.xlu2 %v1699_v59, %s1055_s0 }
 0x124   :  { %v227_v36 = vadd.f32 %v225_v6, %v1422_v24  ;;  %v261_v24 = vadd.f32 %v259_v48, %v1459_v29 }
 0x125   :  { %v435_v42 = vpop.permute.xlu2 %434 }
 0x126   :  { %v235_v15 = vadd.f32 %v233_v21, %v227_v36  ;;  %v437_v27 = vsel %vm64_vm5, %v435_v42, 0.0  ;;  %v355_v36 = vmul.f32 %v1480_v25, %v167_v55 }
 0x127   :  { %v439_v45 = vadd.f32 %v437_v27, %v1604_v51 }
 0x128   :  { %v307_v12 = vmul.f32 %v235_v15, %v235_v15  ;;  %v343_v29 = vmul.f32 %v1480_v25, %v235_v15 }
 0x12a   :  { %v309_v38 = vsub.f32 %v305_v17, %v307_v12  ;;  %v265_v40 = vpop.permute.xlu1 %264 }
 0x12b   :  { %v267_v9 = vsel %vm65_vm6, %v265_v40, 0.0  ;;  %850 = vrot.lane.b32.xlu2 %v1886_v28, %s1055_s0 }
 0x12c   :  { %v269_v10 = vadd.f32 %v267_v9, %v261_v24  ;;  %vm311_vm7 = vcmp.gt.f32.partialorder %v309_v38, 1e-06 }
 0x12d   :  { %v313_v31 = vsel %vm311_vm7, %v309_v38, 1.0  ;;  %v443_v11 = vpop.permute.xlu2 %442 }
 0x12e   :  { %960 = vrcp.f32 %v313_v31  ;;  %v345_v54 = vmul.f32 %v269_v10, %v1457_v30  ;;  %v445_v0 = vsel %vm65_vm6, %v443_v11, 0.0  ;;  %v337_v56 = vand.u32 2147483647, %v313_v31 }
 0x12f   :  { %v1901_v1 = vadd.f32 %v445_v0, %v439_v45  ;;  %v339_v35 = vand.u32 2147483648, %v313_v31  ;;  %v353_v26 = vmul.f32 %v269_v10, %v235_v15  ;;  %vm333_vm9 = vweird.f32 %v313_v31 }
 0x130   :  { %v347_v3 = vsub.f32 %v343_v29, %v345_v54  ;;  %vm338_vm11 = vcmp.eq.f32.partialorder %v337_v56, 8.507059e+37 }
 0x131   :  { %v585_v61 = vmul.f32 %v1790_v32, %v1901_v1  ;;  %v340_v37 = vor.u32 1.1754944e-38, %v339_v35  ;;  %v357_v12 = vsub.f32 %v353_v26, %v355_v36 }
 0x133   :  { %822 = vrot.lane.b32.xlu2 %v1699_v59, %s1056_s1 }
 0x134   :  { %v961_v13 = vpop.eup %960 }
 0x135   :  { %v329_v18 = vmul.f32 %v961_v13, %v313_v31  ;;  %v503_v50 = vpop.permute.xlu2 %502  ;;  %vm334_vm8 = vweird.f32 %v961_v13 }
 0x136   :  { %v505_v6 = vsel %vm64_vm5, %v503_v50, 0.0  ;;  %vm335_vm10 = vmor %vm333_vm9, %vm334_vm8 }
 0x137   :  { %v330_v51 = vsub.f32 1.0, %v329_v18  ;;  %v507_v48 = vadd.f32 %v505_v6, %v1591_v22 }
 0x139   :  { %v331_v30 = vmul.f32 %v961_v13, %v330_v51 }
 0x13a   :  { %v537_v46 = vpop.permute.xlu0 %536 }
 0x13b   :  { %v332_v21 = vadd.f32 %v961_v13, %v331_v30  ;;  %v539_v33 = vsel %vm64_vm5, %v537_v46, 0.0  ;;  %v511_v42 = vpop.permute.xlu1 %510  ;;  %858 = vrot.lane.b32.xlu2 %v1886_v28, %s1056_s1 }
 0x13c   :  { %v513_v15 = vsel %vm65_vm6, %v511_v42, 0.0  ;;  %v541_v25 = vadd.f32 %v539_v33, %v1567_v14 }
 0x13d   :  { %v336_v17 = vsel %vm335_vm10, %v961_v13, %v332_v21  ;;  %v1918_v24 = vadd.f32 %v513_v15, %v507_v48  ;;  %v545_v27 = vpop.permute.xlu2 %544 }
 0x13e   :  { %v341_v55 = vsel %vm338_vm11, %v340_v37, %v336_v17  ;;  %v547_v10 = vsel %vm65_vm6, %v545_v27, 0.0 }
 0x13f   :  { %v349_v40 = vmul.f32 %v347_v3, %v341_v55  ;;  %v359_v9 = vmul.f32 %v357_v12, %v341_v55  ;;  %v587_v22 = vmul.f32 %v1918_v24, %v1918_v24  ;;  %v549_v29 = vadd.f32 %v547_v10, %v541_v25 }
 0x141   :  { %v351_v31 = vsel %vm311_vm7, %v349_v40, 0.0  ;;  %v361_v45 = vsel %vm311_vm7, %v359_v9, 0.0  ;;  %v1926_v54 = vsub.f32 %v585_v61, %v587_v22  ;;  %v1929_v14 = vmul.f32 %v549_v29, %v1790_v32 }
 0x142   :  { %363 = vst [vmem:[#allocation7 + $0x8] sm:$0xff] %v351_v31  ;;  %v1932_v11 = vmul.f32 %v549_v29, %v1918_v24  ;;  %v783_v0 = vpop.permute.xlu0 %782 }
 0x143   :  { %366 = vst [vmem:[#allocation7 + $0x18] sm:$0xff] %v361_v45  ;;  %v255_v3 = vpop.permute.xlu1 %254  ;;  %vm591_vm12 = vcmp.gt.f32.partialorder %v1926_v54, 1e-06 }
 0x144   :  { %v258_v61 = vsel %vm64_vm5, %v255_v3, 0.0  ;;  %v1983_v3 = vsel %vm591_vm12, %v1926_v54, 1.0 }
 0x145   :  { %v1934_v13 = vpop.permute.xlu2 %714  ;;  %v260_v30 = vadd.f32 %v258_v61, %v1633_v41  ;;  %vm613_vm8 = vweird.f32 %v1983_v3 }
 0x14a   :  { %v161_v18 = vpop.permute.xlu0 %160 }
 0x14b   :  { %v433_v51 = vpop.permute.xlu1 %432  ;;  %v164_v37 = vsel %vm65_vm6, %v161_v18, 0.0 }
 0x14c   :  { %v436_v22 = vsel %vm64_vm5, %v433_v51, 0.0 }
 0x14d   :  { %v1936_v50 = vpop.permute.xlu2 %722  ;;  %v438_v29 = vadd.f32 %v436_v22, %v1695_v62  ;;  %v750_v62 = vsel %vm64_vm5, %v1853_v7, 0.0 }
 0x152   :  { %v221_v38 = vpop.permute.xlu0 %220 }
 0x153   :  { %v501_v56 = vpop.permute.xlu1 %500  ;;  %v224_v46 = vsel %vm64_vm5, %v221_v38, 0.0 }
 0x154   :  { %v226_v42 = vadd.f32 %v224_v46, %v1737_v19  ;;  %v751_v46 = vsel %vm64_vm5, %v1845_v47, 0.0 }
 0x155   :  { %v153_v35 = vpop.permute.xlu2 %152 }
 0x156   :  { %v156_v32 = vsel %vm64_vm5, %v153_v35, 0.0 }
 0x157   :  { %v158_v26 = vadd.f32 %v156_v32, %v1689_v53 }
 0x159   :  { %v166_v48 = vadd.f32 %v164_v37, %v158_v26  ;;  %v785_v37 = vsel %vm64_vm5, %v783_v0, 0.0 }
 0x15a   :  { %v263_v6 = vpop.permute.xlu0 %262 }
 0x15b   :  { %v1946_v36 = vpop.permute.xlu1 %542  ;;  %v266_v21 = vsel %vm65_vm6, %v263_v6, 0.0  ;;  %v304_v15 = vmul.f32 %v1447_v5, %v166_v48 }
 0x15c   :  { %v268_v33 = vadd.f32 %v266_v21, %v260_v30  ;;  %v752_v21 = vadd.f32 %v750_v62, %v1334_v2 }
 0x15d   :  { %v229_v17 = vpop.permute.xlu2 %228 }
 0x15e   :  { %v232_v41 = vsel %vm65_vm6, %v229_v17, 0.0  ;;  %v1956_v12 = vmul.f32 %v268_v33, %v1447_v5  ;;  %v504_v5 = vsel %vm64_vm5, %v501_v56, 0.0 }
 0x15f   :  { %v234_v53 = vadd.f32 %v232_v41, %v226_v42  ;;  %v506_v18 = vadd.f32 %v504_v5, %v1740_v8  ;;  %v354_v5 = vmul.f32 %v1472_v34, %v166_v48 }
 0x161   :  { %v306_v25 = vmul.f32 %v234_v53, %v234_v53  ;;  %v1960_v55 = vmul.f32 %v1472_v34, %v234_v53  ;;  %v352_v41 = vmul.f32 %v268_v33, %v234_v53 }
 0x162   :  { %v441_v40 = vpop.permute.xlu0 %440 }
 0x163   :  { %v713_v9 = vpop.permute.xlu1 %712  ;;  %v1962_v27 = vsub.f32 %v304_v15, %v306_v25  ;;  %v346_v19 = vsub.f32 %v1960_v55, %v1956_v12  ;;  %v444_v45 = vsel %vm65_vm6, %v441_v40, 0.0  ;;  %v356_v62 = vsub.f32 %v352_v41, %v354_v5 }
 0x164   :  { %v1986_v51 = vadd.f32 %v444_v45, %v438_v29  ;;  %v716_v15 = vsel %vm64_vm5, %v713_v9, 0.0 }
 0x165   :  { %vm310_vm13 = vcmp.gt.f32.partialorder %v1962_v27, 1e-06  ;;  %v1970_v10 = vpop.permute.xlu2 %534  ;;  %v718_v45 = vadd.f32 %v716_v15, %v1786_v49 }
 0x166   :  { %v312_v31 = vsel %vm310_vm13, %v1962_v27, 1.0  ;;  %v584_v30 = vmul.f32 %v1746_v16, %v1986_v51  ;;  %v538_v27 = vsel %vm64_vm5, %v1970_v10, 0.0 }
 0x167   :  { %962 = vrcp.f32 %v312_v31  ;;  %v323_v17 = vand.u32 2147483647, %v312_v31  ;;  %v325_v40 = vand.u32 2147483648, %v312_v31  ;;  %vm319_vm0 = vweird.f32 %v312_v31 }
 0x168   :  { %964 = vrcp.f32 %v1983_v3 }
 0x169   :  { %vm324_vm2 = vcmp.eq.f32.partialorder %v323_v17, 8.507059e+37 }
 0x16a   :  { %v509_v38 = vpop.permute.xlu0 %508 }
 0x16b   :  { %v721_v56 = vpop.permute.xlu1 %720  ;;  %v512_v35 = vsel %vm65_vm6, %v509_v38, 0.0  ;;  %v717_v38 = vsel %vm64_vm5, %v1934_v13, 0.0  ;;  %v753_v13 = vadd.f32 %v751_v46, %v1332_v63  ;;  %v787_v46 = vadd.f32 %v785_v37, %v1631_v52 }
 0x16c   :  { %v1991_v61 = vadd.f32 %v512_v35, %v506_v18  ;;  %v724_v47 = vsel %vm65_vm6, %v721_v56, 0.0  ;;  %v326_v35 = vor.u32 1.1754944e-38, %v325_v40  ;;  %v719_v63 = vadd.f32 %v717_v38, %v1775_v20 }
 0x16d   :  { %v963_v32 = vpop.eup %962  ;;  %v781_v8 = vpop.permute.xlu2 %780  ;;  %v2035_v34 = vadd.f32 %v724_v47, %v718_v45 }
 0x16e   :  { %v586_v26 = vmul.f32 %v1991_v61, %v1991_v61  ;;  %v315_v6 = vmul.f32 %v963_v32, %v312_v31  ;;  %v2010_v25 = vpop.eup %964  ;;  %vm320_vm14 = vweird.f32 %v963_v32  ;;  %v784_v0 = vsel %vm64_vm5, %v781_v8, 0.0 }
 0x16f   :  { %v609_v18 = vmul.f32 %v2010_v25, %v1983_v3  ;;  %vm321_vm1 = vmor %vm319_vm0, %vm320_vm14  ;;  %v786_v49 = vadd.f32 %v784_v0, %v1693_v43  ;;  %v725_v43 = vsel %vm65_vm6, %v1936_v50, 0.0  ;;  %vm614_vm4 = vweird.f32 %v2010_v25 }
 0x170   :  { %v2006_v42 = vsub.f32 %v584_v30, %v586_v26  ;;  %v316_v7 = vsub.f32 1.0, %v315_v6  ;;  %v2069_v52 = vadd.f32 %v725_v43, %v719_v63  ;;  %vm2109_vm9 = vmor %vm613_vm8, %vm614_vm4 }
 0x172   :  { %vm590_vm15 = vcmp.gt.f32.partialorder %v2006_v42, 1e-06  ;;  %v755_v2 = vpop.permute.xlu0 %754  ;;  %v317_v22 = vmul.f32 %v963_v32, %v316_v7  ;;  %v610_v7 = vsub.f32 1.0, %v609_v18  ;;  %v540_v18 = vadd.f32 %v538_v27, %v1765_v23 }
 0x173   :  { %v2020_v33 = vsel %vm590_vm15, %v2006_v42, 1.0  ;;  %v757_v53 = vpop.permute.xlu1 %756  ;;  %v758_v9 = vsel %vm65_vm6, %v755_v2, 0.0 }
 0x174   :  { %966 = vrcp.f32 %v2020_v33  ;;  %v2027_v29 = vadd.f32 %v758_v9, %v752_v21  ;;  %v318_v56 = vadd.f32 %v963_v32, %v317_v22  ;;  %v759_v8 = vsel %vm65_vm6, %v757_v53, 0.0 }
 0x175   :  { %v789_v48 = vpop.permute.xlu2 %788  ;;  %v2057_v15 = vadd.f32 %v759_v8, %v753_v13  ;;  %v611_v22 = vmul.f32 %v2010_v25, %v610_v7 }
 0x176   :  { %v322_v30 = vsel %vm321_vm1, %v963_v32, %v318_v56  ;;  %v792_v26 = vsel %vm65_vm6, %v789_v48, 0.0  ;;  %v864_v21 = vmul.f32 %v2027_v29, %v2035_v34 }
 0x177   :  { %v327_v31 = vsel %vm324_vm2, %v326_v35, %v322_v30  ;;  %v2043_v6 = vadd.f32 %v792_v26, %v786_v49  ;;  %v865_v53 = vmul.f32 %v2057_v15, %v2069_v52  ;;  %v612_v38 = vadd.f32 %v2010_v25, %v611_v22 }
 0x178   :  { %v348_v32 = vmul.f32 %v346_v19, %v327_v31  ;;  %v358_v17 = vmul.f32 %v356_v62, %v327_v31  ;;  %v619_v35 = vand.u32 2147483648, %v1983_v3  ;;  %v546_v49 = vsel %vm65_vm6, %v1946_v36, 0.0 }
 0x179   :  { %v866_v40 = vmul.f32 %v2043_v6, %v2043_v6  ;;  %v617_v30 = vand.u32 2147483647, %v1983_v3  ;;  %v548_v8 = vadd.f32 %v546_v49, %v540_v18  ;;  %v572_v36 = vsel %vm64_vm5, %v1841_v58, 0.0 }
 0x17a   :  { %v2053_v41 = vpop.eup %966  ;;  %v791_v47 = vpop.permute.xlu0 %790  ;;  %v350_v50 = vsel %vm310_vm13, %v348_v32, 0.0  ;;  %v360_v12 = vsel %vm310_vm13, %v358_v17, 0.0  ;;  %v616_v13 = vsel %vm2109_vm9, %v2010_v25, %v612_v38  ;;  %v603_v31 = vand.u32 2147483647, %v2020_v33 }
 0x17b   :  { %v595_v55 = vmul.f32 %v2053_v41, %v2020_v33  ;;  %v571_v19 = vpop.permute.xlu1 %570  ;;  %v793_v20 = vsel %vm65_vm6, %v791_v47, 0.0  ;;  %362 = vst [vmem:[#allocation7] sm:$0xff] %v350_v50  ;;  %v2071_v37 = vsub.f32 %v864_v21, %v866_v40  ;;  %v620_v7 = vor.u32 1.1754944e-38, %v619_v35 }
 0x17c   :  { %v2073_v2 = vadd.f32 %v793_v20, %v787_v46  ;;  %365 = vst [vmem:[#allocation7 + $0x10] sm:$0xff] %v360_v12  ;;  %vm600_vm10 = vweird.f32 %v2053_v41  ;;  %v605_v32 = vand.u32 2147483648, %v2020_v33  ;;  %v573_v58 = vsel %vm64_vm5, %v571_v19, 0.0 }
 0x17d   :  { %v596_v0 = vsub.f32 1.0, %v595_v55  ;;  %vm870_vm3 = vcmp.gt.f32.partialorder %v2071_v37, 1e-06  ;;  %v815_v9 = vpop.permute.xlu2 %814  ;;  %vm618_vm11 = vcmp.eq.f32.partialorder %v617_v30, 8.507059e+37  ;;  %v574_v25 = vadd.f32 %v572_v36, %v1310_v39 }
 0x17e   :  { %v867_v5 = vmul.f32 %v2073_v2, %v2073_v2  ;;  %v2087_v45 = vsel %vm870_vm3, %v2071_v37, 1.0  ;;  %v624_v63 = vmul.f32 %v548_v8, %v1746_v16  ;;  %v621_v46 = vsel %vm618_vm11, %v620_v7, %v616_v13 }
 0x17f   :  { %968 = vrcp.f32 %v2087_v45  ;;  %v597_v62 = vmul.f32 %v2053_v41, %v596_v0  ;;  %vm599_vm13 = vweird.f32 %v2020_v33  ;;  %v632_v40 = vmul.f32 %v548_v8, %v1991_v61 }
 0x180   :  { %v2091_v10 = vsub.f32 %v865_v53, %v867_v5  ;;  %v818_v50 = vsel %vm64_vm5, %v815_v9, 0.0  ;;  %vm2135_vm14 = vmor %vm599_vm13, %vm600_vm10  ;;  %vm2139_vm0 = vcmp.eq.f32.partialorder %v603_v31, 8.507059e+37  ;;  %v575_v16 = vadd.f32 %v573_v58, %v1829_v60 }
 0x181   :  { %v598_v43 = vadd.f32 %v2053_v41, %v597_v62  ;;  %v606_v20 = vor.u32 1.1754944e-38, %v605_v32  ;;  %v885_v60 = vand.u32 2147483648, %v2087_v45  ;;  %vm879_vm1 = vweird.f32 %v2087_v45 }
 0x182   :  { %vm871_vm7 = vcmp.gt.f32.partialorder %v2091_v10, 1e-06  ;;  %v817_v56 = vpop.permute.xlu0 %816  ;;  %v820_v5 = vadd.f32 %v818_v50, %v1699_v59  ;;  %v883_v38 = vand.u32 2147483647, %v2087_v45 }
 0x183   :  { %v2104_v23 = vsel %vm871_vm7, %v2091_v10, 1.0  ;;  %v849_v48 = vpop.permute.xlu1 %848  ;;  %v819_v33 = vsel %vm64_vm5, %v817_v56, 0.0  ;;  %v602_v19 = vsel %vm2135_vm14, %v2053_v41, %v598_v43 }
 0x184   :  { %970 = vrcp.f32 %v2104_v23  ;;  %v852_v0 = vsel %vm64_vm5, %v849_v48, 0.0  ;;  %v821_v35 = vadd.f32 %v819_v33, %v1691_v57  ;;  %v607_v49 = vsel %vm2139_vm0, %v606_v20, %v602_v19 }
 0x185   :  { %v2120_v21 = vpop.eup %968  ;;  %v851_v3 = vpop.permute.xlu2 %850  ;;  %v854_v30 = vadd.f32 %v852_v0, %v1843_v44  ;;  %v886_v57 = vor.u32 1.1754944e-38, %v885_v60  ;;  %vm893_vm2 = vweird.f32 %v2104_v23 }
 0x186   :  { %v875_v17 = vmul.f32 %v2120_v21, %v2087_v45  ;;  %v853_v7 = vsel %vm64_vm5, %v851_v3, 0.0  ;;  %vm880_vm4 = vweird.f32 %v2120_v21 }
 0x187   :  { %vm2200_vm5 = vmor %vm879_vm1, %vm880_vm4 }
 0x188   :  { %v876_v47 = vsub.f32 1.0, %v875_v17 }
 0x18a   :  { %v2143_v39 = vpop.eup %970  ;;  %v577_v27 = vpop.permute.xlu0 %576  ;;  %v877_v56 = vmul.f32 %v2120_v21, %v876_v47 }
 0x18b   :  { %v889_v22 = vmul.f32 %v2143_v39, %v2104_v23  ;;  %v579_v53 = vpop.permute.xlu1 %578  ;;  %v580_v9 = vsel %vm65_vm6, %v577_v27, 0.0 }
 0x18c   :  { %v581_v41 = vsel %vm65_vm6, %v579_v53, 0.0  ;;  %v582_v18 = vadd.f32 %v580_v9, %v574_v25  ;;  %v897_v9 = vand.u32 2147483647, %v2104_v23 }
 0x18d   :  { %v583_v62 = vadd.f32 %v581_v41, %v575_v16  ;;  %v890_v48 = vsub.f32 1.0, %v889_v22  ;;  %v823_v8 = vpop.permute.xlu2 %822  ;;  %v855_v16 = vadd.f32 %v853_v7, %v1886_v28 }
 0x18e   :  { %v622_v59 = vmul.f32 %v582_v18, %v1991_v61  ;;  %v634_v26 = vmul.f32 %v582_v18, %v1986_v51  ;;  %v826_v31 = vsel %vm65_vm6, %v823_v8, 0.0  ;;  %v878_v51 = vadd.f32 %v2120_v21, %v877_v56 }
 0x18f   :  { %v623_v36 = vmul.f32 %v583_v62, %v1918_v24  ;;  %v635_v13 = vmul.f32 %v583_v62, %v1901_v1  ;;  %v828_v1 = vadd.f32 %v826_v31, %v820_v5  ;;  %v891_v58 = vmul.f32 %v2143_v39, %v890_v48 }
 0x190   :  { %v626_v43 = vsub.f32 %v622_v59, %v624_v63  ;;  %v636_v32 = vsub.f32 %v632_v40, %v634_v26  ;;  %v899_v40 = vand.u32 2147483648, %v2104_v23  ;;  %v882_v28 = vsel %vm2200_vm5, %v2120_v21, %v878_v51 }
 0x191   :  { %v627_v44 = vsub.f32 %v623_v36, %v1929_v14  ;;  %v637_v61 = vsub.f32 %v1932_v11, %v635_v13  ;;  %v904_v20 = vmul.f32 %v828_v1, %v2027_v29  ;;  %v892_v54 = vadd.f32 %v2143_v39, %v891_v58 }
 0x192   :  { %v628_v24 = vmul.f32 %v626_v43, %v607_v49  ;;  %v638_v17 = vmul.f32 %v636_v32, %v607_v49  ;;  %v825_v25 = vpop.permute.xlu0 %824  ;;  %v912_v22 = vmul.f32 %v828_v1, %v2043_v6  ;;  %v900_v62 = vor.u32 1.1754944e-38, %v899_v40 }
 0x193   :  { %v629_v47 = vmul.f32 %v627_v44, %v621_v46  ;;  %v639_v3 = vmul.f32 %v637_v61, %v621_v46  ;;  %v857_v63 = vpop.permute.xlu1 %856  ;;  %v827_v14 = vsel %vm65_vm6, %v825_v25, 0.0 }
 0x194   :  { %v630_v11 = vsel %vm590_vm15, %v628_v24, 0.0  ;;  %v640_v50 = vsel %vm590_vm15, %v638_v17, 0.0  ;;  %v860_v12 = vsel %vm65_vm6, %v857_v63, 0.0  ;;  %v829_v55 = vadd.f32 %v827_v14, %v821_v35 }
 0x195   :  { %v631_v46 = vsel %vm591_vm12, %v629_v47, 0.0  ;;  %v641_v33 = vsel %vm591_vm12, %v639_v3, 0.0  ;;  %643 = vst [vmem:[#allocation7 + $0x20] sm:$0xff] %v630_v11  ;;  %v862_v19 = vadd.f32 %v860_v12, %v854_v30  ;;  %v859_v27 = vpop.permute.xlu2 %858  ;;  %vm894_vm12 = vweird.f32 %v2143_v39 }
 0x196   :  { %644 = vst [vmem:[#allocation7 + $0x28] sm:$0xff] %v631_v46  ;;  %v861_v53 = vsel %vm65_vm6, %v859_v27, 0.0  ;;  %v905_v21 = vmul.f32 %v829_v55, %v2057_v15  ;;  %v913_v60 = vmul.f32 %v829_v55, %v2073_v2  ;;  %vm884_vm15 = vcmp.eq.f32.partialorder %v883_v38, 8.507059e+37  ;;  %vm895_vm8 = vmor %vm893_vm2, %vm894_vm12 }
 0x197   :  { %647 = vst [vmem:[#allocation7 + $0x38] sm:$0xff] %v641_v33  ;;  %v902_v45 = vmul.f32 %v862_v19, %v2043_v6  ;;  %v914_v0 = vmul.f32 %v862_v19, %v2035_v34  ;;  %v863_v29 = vadd.f32 %v861_v53, %v855_v16  ;;  %v887_v6 = vsel %vm884_vm15, %v886_v57, %v882_v28 }
 0x198   :  { %646 = vst [vmem:[#allocation7 + $0x30] sm:$0xff] %v640_v50  ;;  %v896_v18 = vsel %vm895_vm8, %v2143_v39, %v892_v54  ;;  %vm898_vm6 = vcmp.eq.f32.partialorder %v897_v9, 8.507059e+37 }
 0x199   :  { %v906_v5 = vsub.f32 %v902_v45, %v904_v20  ;;  %v916_v41 = vsub.f32 %v912_v22, %v914_v0  ;;  %v903_v34 = vmul.f32 %v863_v29, %v2073_v2  ;;  %v915_v4 = vmul.f32 %v863_v29, %v2069_v52 }
 0x19a   :  { %v901_v48 = vsel %vm898_vm6, %v900_v62, %v896_v18 }
 0x19b   :  { %v908_v56 = vmul.f32 %v906_v5, %v887_v6  ;;  %v918_v35 = vmul.f32 %v916_v41, %v887_v6  ;;  %v907_v15 = vsub.f32 %v903_v34, %v905_v21  ;;  %v917_v49 = vsub.f32 %v913_v60, %v915_v4 }
 0x19d   :  { %v910_v38 = vsel %vm870_vm3, %v908_v56, 0.0  ;;  %v920_v23 = vsel %vm870_vm3, %v918_v35, 0.0  ;;  %v909_v52 = vmul.f32 %v907_v15, %v901_v48  ;;  %v919_v2 = vmul.f32 %v917_v49, %v901_v48 }
 0x19e   :  { %923 = vst [vmem:[#allocation7 + $0x40] sm:$0xff] %v910_v38 }
 0x19f   :  { %926 = vst [vmem:[#allocation7 + $0x50] sm:$0xff] %v920_v23  ;;  %v911_v39 = vsel %vm871_vm7, %v909_v52, 0.0  ;;  %v921_v30 = vsel %vm871_vm7, %v919_v2, 0.0 }
 0x1a0   :  { %924 = vst [vmem:[#allocation7 + $0x48] sm:$0xff] %v911_v39 }
 0x1a1   :  { %927 = vst [vmem:[#allocation7 + $0x58] sm:$0xff] %v921_v30 }
 0x1a2   :  { %940 = dma.vmem_to_hbm [thread:$0]  %s933_s23, 1536, %s935_s26, [#allocation4], %s1051_s17, %s1051_s17, %s1052_s18  }
 0x1a3   :  { %1048 = dma.done.wait [#allocation4], 1536  }
 0x1a4   :  { %1049 = vsyncadd [#allocation4], 4294965760 }
 0x1a5   :  { %945 = vsyncpa [#allocation3], 1 }
 0x1a6   :  { %946 = vsyncpa [#allocation6], 1 }
 0x1a7   :  { %947 = vsyncpa [#allocation4], 1 }

</bundles_post_ra>
